<compile_context>
chip_gen: v6e
topology: v6e:2x2x1
jax: 0.10.0
libtpu: 0.0.40
codegen_flags: <defaults>
</compile_context>

<pallas_src>
import jax
import jax.numpy as jnp
from jax.experimental import pallas as pl
from jax.experimental.pallas import tpu as pltpu

HIDDEN = 8
NUM_LAYERS = 2
INPUT_SIZE = 1
G4 = 4 * HIDDEN


def lstm_fc_kernel(x_ref, wih0_ref, whh0_ref, b0_ref,
                   wih1_ref, whh1_ref, b1_ref, fcw_ref, fcb_ref,
                   out_ref, hn_ref, cn_ref):
    B, T = x_ref.shape          # batch block, sequence length
    H = HIDDEN

    whh0 = whh0_ref[...]        # (H, 4H)   gate cols [i, f, o, g], i/f/o pre-scaled by 0.5
    wih1 = wih1_ref[...]        # (H, 4H)
    whh1 = whh1_ref[...]        # (H, 4H)
    b1 = b1_ref[...]            # (1, 4H)

    # Hoisted layer-0 input projection (no dependence on the recurrence):
    # one vectorized VPU broadcast-multiply-add over all timesteps at once.
    xproj_all = (x_ref[...][..., None] * wih0_ref[...][None, :, :]
                 + b0_ref[...][None, :, :])                       # (B, T, 4H)

    def gates_to_hc(gates, c):
        # gates columns: [i | f | o | g]; i/f/o pre-activations are already
        # halved in the weights, so ONE tanh over 4H lanes serves both the
        # three sigmoid gates (0.5*tanh(z/2)+0.5) and the tanh gate.
        y = jnp.tanh(gates)
        sfo = 0.5 * y[:, 0:3 * H] + 0.5
        g = y[:, 3 * H:4 * H]
        i = sfo[:, 0:H]
        f = sfo[:, H:2 * H]
        o = sfo[:, 2 * H:3 * H]
        c_new = f * c + i * g
        h_new = o * jnp.tanh(c_new)
        return h_new, c_new

    zeros = jnp.zeros((B, H), jnp.float32)
    h0, c0, h1, c1 = zeros, zeros, zeros, zeros

    # Fully unrolled time loop (T is static and small).
    for t in range(T):
        # layer 0: only the recurrent dot sits on the serial chain.
        gates0 = xproj_all[:, t, :] + jnp.dot(
            h0, whh0, preferred_element_type=jnp.float32)
        h0, c0 = gates_to_hc(gates0, c0)
        # layer 1: two dots pipeline back-to-back in the MXU (no concat).
        gates1 = (jnp.dot(h0, wih1, preferred_element_type=jnp.float32)
                  + jnp.dot(h1, whh1, preferred_element_type=jnp.float32)
                  + b1)
        h1, c1 = gates_to_hc(gates1, c1)

    # Linear on the last timestep's top-layer hidden state.
    out_ref[...] = (jnp.dot(h1, fcw_ref[...],
                            preferred_element_type=jnp.float32) + fcb_ref[...])
    # Single consolidated store per state tensor.
    hn_ref[...] = jnp.stack([h0, h1])
    cn_ref[...] = jnp.stack([c0, c1])


def init_params(key):
    """Raw PyTorch-style LSTM/Linear weights, uniform(-1/sqrt(H), 1/sqrt(H))."""
    k = 1.0 / jnp.sqrt(jnp.float32(HIDDEN))
    keys = jax.random.split(key, 12)

    def u(kk, shape):
        return jax.random.uniform(kk, shape, jnp.float32, -k, k)

    return dict(
        w_ih0=u(keys[0], (G4, INPUT_SIZE)),
        w_hh0=u(keys[1], (G4, HIDDEN)),
        b_ih0=u(keys[2], (G4,)),
        b_hh0=u(keys[3], (G4,)),
        w_ih1=u(keys[4], (G4, HIDDEN)),
        w_hh1=u(keys[5], (G4, HIDDEN)),
        b_ih1=u(keys[6], (G4,)),
        b_hh1=u(keys[7], (G4,)),
        fc_w=u(keys[8], (1, HIDDEN)),
        fc_b=u(keys[9], (1,)),
    )


def prepare_kernel_params(raw):
    """Kernel layout: transposed weights, combined biases, gate columns permuted
    from PyTorch [i, f, g, o] to [i, f, o, g], and the i/f/o columns scaled by
    0.5 so sigmoid can be recovered from a single full-width tanh."""
    H = HIDDEN
    perm = jnp.concatenate([
        jnp.arange(0 * H, 1 * H),   # i
        jnp.arange(1 * H, 2 * H),   # f
        jnp.arange(3 * H, 4 * H),   # o
        jnp.arange(2 * H, 3 * H),   # g
    ])
    # sigmoid(z) = 0.5 * tanh(z / 2) + 0.5  ->  halve i/f/o pre-activations.
    scale = jnp.concatenate(
        [jnp.full((3 * H,), 0.5, jnp.float32),
         jnp.ones((H,), jnp.float32)]).reshape(1, G4)

    def prep_w(w):                       # (4H, K) torch layout -> (K, 4H)
        return (w.T[:, perm]) * scale

    def prep_b(b_ih, b_hh):
        return (((b_ih + b_hh).reshape(1, G4))[:, perm]) * scale

    return dict(
        wih0=prep_w(raw["w_ih0"]),       # (1, 4H)
        whh0=prep_w(raw["w_hh0"]),       # (H, 4H)
        b0=prep_b(raw["b_ih0"], raw["b_hh0"]),
        wih1=prep_w(raw["w_ih1"]),       # (H, 4H)
        whh1=prep_w(raw["w_hh1"]),       # (H, 4H)
        b1=prep_b(raw["b_ih1"], raw["b_hh1"]),
        fcw=raw["fc_w"].T,               # (H, 1)
        fcb=raw["fc_b"].reshape(1, 1),
    )


def my_model_forward(x, kparams):
    """x: (B, T, 1) float32, batch_first like the PyTorch module (hidden=None)."""
    B, T, F = x.shape
    assert F == INPUT_SIZE
    x2d = x.reshape(B, T)                # size-1 feature squeezed, T on lanes

    # Batch block: 8 sublanes (f32) per grid step; grid axis is "parallel" so
    # large B shards across both v7x TensorCores. At B=2 this is grid=(1,).
    BB = 8 if B % 8 == 0 else B
    grid = (B // BB,)
    # TODO(synk): when B*BB blocks grow, budget block size against v7x's
    #             smaller VMEM (64 MiB physical / 32 MiB scoped default).

    in_specs = [
        pl.BlockSpec((BB, T), lambda b: (b, 0)),            # x
        pl.BlockSpec((1, G4), lambda b: (0, 0)),            # wih0
        pl.BlockSpec((HIDDEN, G4), lambda b: (0, 0)),       # whh0
        pl.BlockSpec((1, G4), lambda b: (0, 0)),            # b0
        pl.BlockSpec((HIDDEN, G4), lambda b: (0, 0)),       # wih1
        pl.BlockSpec((HIDDEN, G4), lambda b: (0, 0)),       # whh1
        pl.BlockSpec((1, G4), lambda b: (0, 0)),            # b1
        pl.BlockSpec((HIDDEN, 1), lambda b: (0, 0)),        # fcw
        pl.BlockSpec((1, 1), lambda b: (0, 0)),             # fcb
    ]
    out_specs = (
        pl.BlockSpec((BB, 1), lambda b: (b, 0)),
        pl.BlockSpec((NUM_LAYERS, BB, HIDDEN), lambda b: (0, b, 0)),
        pl.BlockSpec((NUM_LAYERS, BB, HIDDEN), lambda b: (0, b, 0)),
    )
    out_shape = (
        jax.ShapeDtypeStruct((B, 1), jnp.float32),
        jax.ShapeDtypeStruct((NUM_LAYERS, B, HIDDEN), jnp.float32),
        jax.ShapeDtypeStruct((NUM_LAYERS, B, HIDDEN), jnp.float32),
    )

    out, h_n, c_n = pl.pallas_call(
        lstm_fc_kernel,
        out_shape=out_shape,
        grid=grid,
        in_specs=in_specs,
        out_specs=out_specs,
        compiler_params=pltpu.CompilerParams(
            dimension_semantics=("parallel",)),
    )(x2d, kparams["wih0"], kparams["whh0"], kparams["b0"],
      kparams["wih1"], kparams["whh1"], kparams["b1"],
      kparams["fcw"], kparams["fcb"])
    return out, (h_n, c_n)


def _reference_forward(x, raw):
    """Pure-JAX reference using raw PyTorch-layout weights (gate order i,f,g,o)."""
    B, T, _ = x.shape
    H = HIDDEN

    def cell(x_t, h, c, w_ih, w_hh, b_ih, b_hh):
        gates = x_t @ w_ih.T + h @ w_hh.T + b_ih + b_hh
        i = jax.nn.sigmoid(gates[:, 0 * H:1 * H])
        f = jax.nn.sigmoid(gates[:, 1 * H:2 * H])
        g = jnp.tanh(gates[:, 2 * H:3 * H])
        o = jax.nn.sigmoid(gates[:, 3 * H:4 * H])
        c = f * c + i * g
        h = o * jnp.tanh(c)
        return h, c

    h0 = c0 = h1 = c1 = jnp.zeros((B, H), jnp.float32)
    for t in range(T):
        x_t = x[:, t, :]
        h0, c0 = cell(x_t, h0, c0, raw["w_ih0"], raw["w_hh0"],
                      raw["b_ih0"], raw["b_hh0"])
        h1, c1 = cell(h0, h1, c1, raw["w_ih1"], raw["w_hh1"],
                      raw["b_ih1"], raw["b_hh1"])
    out = h1 @ raw["fc_w"].T + raw["fc_b"]
    return out, (jnp.stack([h0, h1]), jnp.stack([c0, c1]))


if __name__ == "__main__":
    key = jax.random.PRNGKey(0)
    pkey, xkey = jax.random.split(key)

    raw = init_params(pkey)
    kparams = prepare_kernel_params(raw)

    B, T = 2, 8                                   # batch=2, seq=8, feature=1
    x = jax.random.normal(xkey, (B, T, 1), jnp.float32)

    out, (h_n, c_n) = my_model_forward(x, kparams)
    jax.block_until_ready((out, h_n, c_n))

    # correctness check vs pure-JAX reference (original PyTorch gate layout)
    ref_out, (ref_h, ref_c) = _reference_forward(x, raw)
    assert out.shape == (B, 1)
    assert h_n.shape == (NUM_LAYERS, B, HIDDEN)
    assert c_n.shape == (NUM_LAYERS, B, HIDDEN)
    assert jnp.allclose(out, ref_out, atol=1e-4)
    assert jnp.allclose(h_n, ref_h, atol=1e-4)
    assert jnp.allclose(c_n, ref_c, atol=1e-4)

    print("KERNEL_OK")
</pallas_src>

<mosaic_0001>
module attributes {stable_mosaic.version = 11 : i64} {
  func.func @lstm_fc_kernel(%arg0: i32, %arg1: memref<2x8xf32, #tpu.memory_space<vmem>>, %arg2: memref<1x32xf32, #tpu.memory_space<vmem>>, %arg3: memref<8x32xf32, #tpu.memory_space<vmem>>, %arg4: memref<1x32xf32, #tpu.memory_space<vmem>>, %arg5: memref<8x32xf32, #tpu.memory_space<vmem>>, %arg6: memref<8x32xf32, #tpu.memory_space<vmem>>, %arg7: memref<1x32xf32, #tpu.memory_space<vmem>>, %arg8: memref<8x1xf32, #tpu.memory_space<vmem>>, %arg9: memref<1x1xf32, #tpu.memory_space<vmem>>, %arg10: memref<2x1xf32, #tpu.memory_space<vmem>>, %arg11: memref<2x2x8xf32, #tpu.memory_space<vmem>>, %arg12: memref<2x2x8xf32, #tpu.memory_space<vmem>>) attributes {dimension_semantics = [#tpu.dimension_semantics<parallel>], iteration_bounds = array<i64: 1>, scalar_prefetch = 0 : i64, scratch_operands = 0 : i64, tpu.core_type = #tpu.core_type<tc>, window_params = [{transform_indices = @transform_0, window_bounds = array<i64: 2, 8>}, {pipeline_mode = #tpu.pipeline_mode<synchronous>, transform_indices = @transform_1, window_bounds = array<i64: 1, 32>}, {pipeline_mode = #tpu.pipeline_mode<synchronous>, transform_indices = @transform_2, window_bounds = array<i64: 8, 32>}, {pipeline_mode = #tpu.pipeline_mode<synchronous>, transform_indices = @transform_3, window_bounds = array<i64: 1, 32>}, {pipeline_mode = #tpu.pipeline_mode<synchronous>, transform_indices = @transform_4, window_bounds = array<i64: 8, 32>}, {pipeline_mode = #tpu.pipeline_mode<synchronous>, transform_indices = @transform_5, window_bounds = array<i64: 8, 32>}, {pipeline_mode = #tpu.pipeline_mode<synchronous>, transform_indices = @transform_6, window_bounds = array<i64: 1, 32>}, {pipeline_mode = #tpu.pipeline_mode<synchronous>, transform_indices = @transform_7, window_bounds = array<i64: 8, 1>}, {pipeline_mode = #tpu.pipeline_mode<synchronous>, transform_indices = @transform_8, window_bounds = array<i64: 1, 1>}, {transform_indices = @transform_9, window_bounds = array<i64: 2, 1>}, {transform_indices = @transform_10, window_bounds = array<i64: 2, 2, 8>}, {transform_indices = @transform_11, window_bounds = array<i64: 2, 2, 8>}]} {
    %c0 = arith.constant 0 : index
    %c0_0 = arith.constant 0 : index
    %0 = vector.load %arg3[%c0, %c0_0] : memref<8x32xf32, #tpu.memory_space<vmem>>, vector<8x32xf32>
    %c0_1 = arith.constant 0 : index
    %c0_2 = arith.constant 0 : index
    %1 = vector.load %arg5[%c0_1, %c0_2] : memref<8x32xf32, #tpu.memory_space<vmem>>, vector<8x32xf32>
    %c0_3 = arith.constant 0 : index
    %c0_4 = arith.constant 0 : index
    %2 = vector.load %arg6[%c0_3, %c0_4] : memref<8x32xf32, #tpu.memory_space<vmem>>, vector<8x32xf32>
    %c0_5 = arith.constant 0 : index
    %c0_6 = arith.constant 0 : index
    %3 = vector.load %arg7[%c0_5, %c0_6] : memref<1x32xf32, #tpu.memory_space<vmem>>, vector<1x32xf32>
    %c0_7 = arith.constant 0 : index
    %c0_8 = arith.constant 0 : index
    %4 = vector.load %arg1[%c0_7, %c0_8] : memref<2x8xf32, #tpu.memory_space<vmem>>, vector<2x8xf32>
    %5 = vector.shape_cast %4 : vector<2x8xf32> to vector<2x8x1xf32>
    %c0_9 = arith.constant 0 : index
    %c0_10 = arith.constant 0 : index
    %6 = vector.load %arg2[%c0_9, %c0_10] : memref<1x32xf32, #tpu.memory_space<vmem>>, vector<1x32xf32>
    %7 = vector.shape_cast %6 : vector<1x32xf32> to vector<1x1x32xf32>
    %8 = vector.broadcast %5 : vector<2x8x1xf32> to vector<2x8x32xf32>
    %9 = vector.broadcast %7 : vector<1x1x32xf32> to vector<2x8x32xf32>
    %10 = arith.mulf %8, %9 : vector<2x8x32xf32>
    %c0_11 = arith.constant 0 : index
    %c0_12 = arith.constant 0 : index
    %11 = vector.load %arg4[%c0_11, %c0_12] : memref<1x32xf32, #tpu.memory_space<vmem>>, vector<1x32xf32>
    %12 = vector.shape_cast %11 : vector<1x32xf32> to vector<1x1x32xf32>
    %13 = vector.broadcast %12 : vector<1x1x32xf32> to vector<2x8x32xf32>
    %14 = arith.addf %10, %13 : vector<2x8x32xf32>
    %cst = arith.constant 0.000000e+00 : f32
    %15 = vector.broadcast %cst : f32 to vector<2x8xf32>
    %16 = vector.extract_strided_slice %14 {offsets = [0, 0, 0], sizes = [2, 1, 32], strides = [1, 1, 1]} : vector<2x8x32xf32> to vector<2x1x32xf32>
    %17 = vector.shape_cast %16 : vector<2x1x32xf32> to vector<2x32xf32>
    %cst_13 = arith.constant dense<0.000000e+00> : vector<2x32xf32>
    %18 = tpu.matmul %15, %0, %cst_13 {dimension_numbers = #tpu.dot_dimension_numbers<[1], [0], [0], [1], [0, 0, 1, 1], [], []>} : vector<2x8xf32>, vector<8x32xf32>, vector<2x32xf32> -> vector<2x32xf32>
    %19 = arith.addf %17, %18 : vector<2x32xf32>
    %20 = math.tanh %19 : vector<2x32xf32>
    %21 = vector.extract_strided_slice %20 {offsets = [0, 0], sizes = [2, 24], strides = [1, 1]} : vector<2x32xf32> to vector<2x24xf32>
    %cst_14 = arith.constant 5.000000e-01 : f32
    %22 = vector.broadcast %cst_14 : f32 to vector<2x24xf32>
    %23 = arith.mulf %22, %21 : vector<2x24xf32>
    %cst_15 = arith.constant 5.000000e-01 : f32
    %24 = vector.broadcast %cst_15 : f32 to vector<2x24xf32>
    %25 = arith.addf %23, %24 : vector<2x24xf32>
    %26 = vector.extract_strided_slice %20 {offsets = [0, 24], sizes = [2, 8], strides = [1, 1]} : vector<2x32xf32> to vector<2x8xf32>
    %27 = vector.extract_strided_slice %25 {offsets = [0, 0], sizes = [2, 8], strides = [1, 1]} : vector<2x24xf32> to vector<2x8xf32>
    %28 = vector.extract_strided_slice %25 {offsets = [0, 8], sizes = [2, 8], strides = [1, 1]} : vector<2x24xf32> to vector<2x8xf32>
    %29 = vector.extract_strided_slice %25 {offsets = [0, 16], sizes = [2, 8], strides = [1, 1]} : vector<2x24xf32> to vector<2x8xf32>
    %30 = arith.mulf %28, %15 : vector<2x8xf32>
    %31 = arith.mulf %27, %26 : vector<2x8xf32>
    %32 = arith.addf %30, %31 : vector<2x8xf32>
    %33 = math.tanh %32 : vector<2x8xf32>
    %34 = arith.mulf %29, %33 : vector<2x8xf32>
    %cst_16 = arith.constant dense<0.000000e+00> : vector<2x32xf32>
    %35 = tpu.matmul %34, %1, %cst_16 {dimension_numbers = #tpu.dot_dimension_numbers<[1], [0], [0], [1], [0, 0, 1, 1], [], []>} : vector<2x8xf32>, vector<8x32xf32>, vector<2x32xf32> -> vector<2x32xf32>
    %cst_17 = arith.constant dense<0.000000e+00> : vector<2x32xf32>
    %36 = tpu.matmul %15, %2, %cst_17 {dimension_numbers = #tpu.dot_dimension_numbers<[1], [0], [0], [1], [0, 0, 1, 1], [], []>} : vector<2x8xf32>, vector<8x32xf32>, vector<2x32xf32> -> vector<2x32xf32>
    %37 = arith.addf %35, %36 : vector<2x32xf32>
    %38 = vector.broadcast %3 : vector<1x32xf32> to vector<2x32xf32>
    %39 = arith.addf %37, %38 : vector<2x32xf32>
    %40 = math.tanh %39 : vector<2x32xf32>
    %41 = vector.extract_strided_slice %40 {offsets = [0, 0], sizes = [2, 24], strides = [1, 1]} : vector<2x32xf32> to vector<2x24xf32>
    %cst_18 = arith.constant 5.000000e-01 : f32
    %42 = vector.broadcast %cst_18 : f32 to vector<2x24xf32>
    %43 = arith.mulf %42, %41 : vector<2x24xf32>
    %cst_19 = arith.constant 5.000000e-01 : f32
    %44 = vector.broadcast %cst_19 : f32 to vector<2x24xf32>
    %45 = arith.addf %43, %44 : vector<2x24xf32>
    %46 = vector.extract_strided_slice %40 {offsets = [0, 24], sizes = [2, 8], strides = [1, 1]} : vector<2x32xf32> to vector<2x8xf32>
    %47 = vector.extract_strided_slice %45 {offsets = [0, 0], sizes = [2, 8], strides = [1, 1]} : vector<2x24xf32> to vector<2x8xf32>
    %48 = vector.extract_strided_slice %45 {offsets = [0, 8], sizes = [2, 8], strides = [1, 1]} : vector<2x24xf32> to vector<2x8xf32>
    %49 = vector.extract_strided_slice %45 {offsets = [0, 16], sizes = [2, 8], strides = [1, 1]} : vector<2x24xf32> to vector<2x8xf32>
    %50 = arith.mulf %48, %15 : vector<2x8xf32>
    %51 = arith.mulf %47, %46 : vector<2x8xf32>
    %52 = arith.addf %50, %51 : vector<2x8xf32>
    %53 = math.tanh %52 : vector<2x8xf32>
    %54 = arith.mulf %49, %53 : vector<2x8xf32>
    %55 = vector.extract_strided_slice %14 {offsets = [0, 1, 0], sizes = [2, 1, 32], strides = [1, 1, 1]} : vector<2x8x32xf32> to vector<2x1x32xf32>
    %56 = vector.shape_cast %55 : vector<2x1x32xf32> to vector<2x32xf32>
    %cst_20 = arith.constant dense<0.000000e+00> : vector<2x32xf32>
    %57 = tpu.matmul %34, %0, %cst_20 {dimension_numbers = #tpu.dot_dimension_numbers<[1], [0], [0], [1], [0, 0, 1, 1], [], []>} : vector<2x8xf32>, vector<8x32xf32>, vector<2x32xf32> -> vector<2x32xf32>
    %58 = arith.addf %56, %57 : vector<2x32xf32>
    %59 = math.tanh %58 : vector<2x32xf32>
    %60 = vector.extract_strided_slice %59 {offsets = [0, 0], sizes = [2, 24], strides = [1, 1]} : vector<2x32xf32> to vector<2x24xf32>
    %cst_21 = arith.constant 5.000000e-01 : f32
    %61 = vector.broadcast %cst_21 : f32 to vector<2x24xf32>
    %62 = arith.mulf %61, %60 : vector<2x24xf32>
    %cst_22 = arith.constant 5.000000e-01 : f32
    %63 = vector.broadcast %cst_22 : f32 to vector<2x24xf32>
    %64 = arith.addf %62, %63 : vector<2x24xf32>
    %65 = vector.extract_strided_slice %59 {offsets = [0, 24], sizes = [2, 8], strides = [1, 1]} : vector<2x32xf32> to vector<2x8xf32>
    %66 = vector.extract_strided_slice %64 {offsets = [0, 0], sizes = [2, 8], strides = [1, 1]} : vector<2x24xf32> to vector<2x8xf32>
    %67 = vector.extract_strided_slice %64 {offsets = [0, 8], sizes = [2, 8], strides = [1, 1]} : vector<2x24xf32> to vector<2x8xf32>
    %68 = vector.extract_strided_slice %64 {offsets = [0, 16], sizes = [2, 8], strides = [1, 1]} : vector<2x24xf32> to vector<2x8xf32>
    %69 = arith.mulf %67, %32 : vector<2x8xf32>
    %70 = arith.mulf %66, %65 : vector<2x8xf32>
    %71 = arith.addf %69, %70 : vector<2x8xf32>
    %72 = math.tanh %71 : vector<2x8xf32>
    %73 = arith.mulf %68, %72 : vector<2x8xf32>
    %cst_23 = arith.constant dense<0.000000e+00> : vector<2x32xf32>
    %74 = tpu.matmul %73, %1, %cst_23 {dimension_numbers = #tpu.dot_dimension_numbers<[1], [0], [0], [1], [0, 0, 1, 1], [], []>} : vector<2x8xf32>, vector<8x32xf32>, vector<2x32xf32> -> vector<2x32xf32>
    %cst_24 = arith.constant dense<0.000000e+00> : vector<2x32xf32>
    %75 = tpu.matmul %54, %2, %cst_24 {dimension_numbers = #tpu.dot_dimension_numbers<[1], [0], [0], [1], [0, 0, 1, 1], [], []>} : vector<2x8xf32>, vector<8x32xf32>, vector<2x32xf32> -> vector<2x32xf32>
    %76 = arith.addf %74, %75 : vector<2x32xf32>
    %77 = vector.broadcast %3 : vector<1x32xf32> to vector<2x32xf32>
    %78 = arith.addf %76, %77 : vector<2x32xf32>
    %79 = math.tanh %78 : vector<2x32xf32>
    %80 = vector.extract_strided_slice %79 {offsets = [0, 0], sizes = [2, 24], strides = [1, 1]} : vector<2x32xf32> to vector<2x24xf32>
    %cst_25 = arith.constant 5.000000e-01 : f32
    %81 = vector.broadcast %cst_25 : f32 to vector<2x24xf32>
    %82 = arith.mulf %81, %80 : vector<2x24xf32>
    %cst_26 = arith.constant 5.000000e-01 : f32
    %83 = vector.broadcast %cst_26 : f32 to vector<2x24xf32>
    %84 = arith.addf %82, %83 : vector<2x24xf32>
    %85 = vector.extract_strided_slice %79 {offsets = [0, 24], sizes = [2, 8], strides = [1, 1]} : vector<2x32xf32> to vector<2x8xf32>
    %86 = vector.extract_strided_slice %84 {offsets = [0, 0], sizes = [2, 8], strides = [1, 1]} : vector<2x24xf32> to vector<2x8xf32>
    %87 = vector.extract_strided_slice %84 {offsets = [0, 8], sizes = [2, 8], strides = [1, 1]} : vector<2x24xf32> to vector<2x8xf32>
    %88 = vector.extract_strided_slice %84 {offsets = [0, 16], sizes = [2, 8], strides = [1, 1]} : vector<2x24xf32> to vector<2x8xf32>
    %89 = arith.mulf %87, %52 : vector<2x8xf32>
    %90 = arith.mulf %86, %85 : vector<2x8xf32>
    %91 = arith.addf %89, %90 : vector<2x8xf32>
    %92 = math.tanh %91 : vector<2x8xf32>
    %93 = arith.mulf %88, %92 : vector<2x8xf32>
    %94 = vector.extract_strided_slice %14 {offsets = [0, 2, 0], sizes = [2, 1, 32], strides = [1, 1, 1]} : vector<2x8x32xf32> to vector<2x1x32xf32>
    %95 = vector.shape_cast %94 : vector<2x1x32xf32> to vector<2x32xf32>
    %cst_27 = arith.constant dense<0.000000e+00> : vector<2x32xf32>
    %96 = tpu.matmul %73, %0, %cst_27 {dimension_numbers = #tpu.dot_dimension_numbers<[1], [0], [0], [1], [0, 0, 1, 1], [], []>} : vector<2x8xf32>, vector<8x32xf32>, vector<2x32xf32> -> vector<2x32xf32>
    %97 = arith.addf %95, %96 : vector<2x32xf32>
    %98 = math.tanh %97 : vector<2x32xf32>
    %99 = vector.extract_strided_slice %98 {offsets = [0, 0], sizes = [2, 24], strides = [1, 1]} : vector<2x32xf32> to vector<2x24xf32>
    %cst_28 = arith.constant 5.000000e-01 : f32
    %100 = vector.broadcast %cst_28 : f32 to vector<2x24xf32>
    %101 = arith.mulf %100, %99 : vector<2x24xf32>
    %cst_29 = arith.constant 5.000000e-01 : f32
    %102 = vector.broadcast %cst_29 : f32 to vector<2x24xf32>
    %103 = arith.addf %101, %102 : vector<2x24xf32>
    %104 = vector.extract_strided_slice %98 {offsets = [0, 24], sizes = [2, 8], strides = [1, 1]} : vector<2x32xf32> to vector<2x8xf32>
    %105 = vector.extract_strided_slice %103 {offsets = [0, 0], sizes = [2, 8], strides = [1, 1]} : vector<2x24xf32> to vector<2x8xf32>
    %106 = vector.extract_strided_slice %103 {offsets = [0, 8], sizes = [2, 8], strides = [1, 1]} : vector<2x24xf32> to vector<2x8xf32>
    %107 = vector.extract_strided_slice %103 {offsets = [0, 16], sizes = [2, 8], strides = [1, 1]} : vector<2x24xf32> to vector<2x8xf32>
    %108 = arith.mulf %106, %71 : vector<2x8xf32>
    %109 = arith.mulf %105, %104 : vector<2x8xf32>
    %110 = arith.addf %108, %109 : vector<2x8xf32>
    %111 = math.tanh %110 : vector<2x8xf32>
    %112 = arith.mulf %107, %111 : vector<2x8xf32>
    %cst_30 = arith.constant dense<0.000000e+00> : vector<2x32xf32>
    %113 = tpu.matmul %112, %1, %cst_30 {dimension_numbers = #tpu.dot_dimension_numbers<[1], [0], [0], [1], [0, 0, 1, 1], [], []>} : vector<2x8xf32>, vector<8x32xf32>, vector<2x32xf32> -> vector<2x32xf32>
    %cst_31 = arith.constant dense<0.000000e+00> : vector<2x32xf32>
    %114 = tpu.matmul %93, %2, %cst_31 {dimension_numbers = #tpu.dot_dimension_numbers<[1], [0], [0], [1], [0, 0, 1, 1], [], []>} : vector<2x8xf32>, vector<8x32xf32>, vector<2x32xf32> -> vector<2x32xf32>
    %115 = arith.addf %113, %114 : vector<2x32xf32>
    %116 = vector.broadcast %3 : vector<1x32xf32> to vector<2x32xf32>
    %117 = arith.addf %115, %116 : vector<2x32xf32>
    %118 = math.tanh %117 : vector<2x32xf32>
    %119 = vector.extract_strided_slice %118 {offsets = [0, 0], sizes = [2, 24], strides = [1, 1]} : vector<2x32xf32> to vector<2x24xf32>
    %cst_32 = arith.constant 5.000000e-01 : f32
    %120 = vector.broadcast %cst_32 : f32 to vector<2x24xf32>
    %121 = arith.mulf %120, %119 : vector<2x24xf32>
    %cst_33 = arith.constant 5.000000e-01 : f32
    %122 = vector.broadcast %cst_33 : f32 to vector<2x24xf32>
    %123 = arith.addf %121, %122 : vector<2x24xf32>
    %124 = vector.extract_strided_slice %118 {offsets = [0, 24], sizes = [2, 8], strides = [1, 1]} : vector<2x32xf32> to vector<2x8xf32>
    %125 = vector.extract_strided_slice %123 {offsets = [0, 0], sizes = [2, 8], strides = [1, 1]} : vector<2x24xf32> to vector<2x8xf32>
    %126 = vector.extract_strided_slice %123 {offsets = [0, 8], sizes = [2, 8], strides = [1, 1]} : vector<2x24xf32> to vector<2x8xf32>
    %127 = vector.extract_strided_slice %123 {offsets = [0, 16], sizes = [2, 8], strides = [1, 1]} : vector<2x24xf32> to vector<2x8xf32>
    %128 = arith.mulf %126, %91 : vector<2x8xf32>
    %129 = arith.mulf %125, %124 : vector<2x8xf32>
    %130 = arith.addf %128, %129 : vector<2x8xf32>
    %131 = math.tanh %130 : vector<2x8xf32>
    %132 = arith.mulf %127, %131 : vector<2x8xf32>
    %133 = vector.extract_strided_slice %14 {offsets = [0, 3, 0], sizes = [2, 1, 32], strides = [1, 1, 1]} : vector<2x8x32xf32> to vector<2x1x32xf32>
    %134 = vector.shape_cast %133 : vector<2x1x32xf32> to vector<2x32xf32>
    %cst_34 = arith.constant dense<0.000000e+00> : vector<2x32xf32>
    %135 = tpu.matmul %112, %0, %cst_34 {dimension_numbers = #tpu.dot_dimension_numbers<[1], [0], [0], [1], [0, 0, 1, 1], [], []>} : vector<2x8xf32>, vector<8x32xf32>, vector<2x32xf32> -> vector<2x32xf32>
    %136 = arith.addf %134, %135 : vector<2x32xf32>
    %137 = math.tanh %136 : vector<2x32xf32>
    %138 = vector.extract_strided_slice %137 {offsets = [0, 0], sizes = [2, 24], strides = [1, 1]} : vector<2x32xf32> to vector<2x24xf32>
    %cst_35 = arith.constant 5.000000e-01 : f32
    %139 = vector.broadcast %cst_35 : f32 to vector<2x24xf32>
    %140 = arith.mulf %139, %138 : vector<2x24xf32>
    %cst_36 = arith.constant 5.000000e-01 : f32
    %141 = vector.broadcast %cst_36 : f32 to vector<2x24xf32>
    %142 = arith.addf %140, %141 : vector<2x24xf32>
    %143 = vector.extract_strided_slice %137 {offsets = [0, 24], sizes = [2, 8], strides = [1, 1]} : vector<2x32xf32> to vector<2x8xf32>
    %144 = vector.extract_strided_slice %142 {offsets = [0, 0], sizes = [2, 8], strides = [1, 1]} : vector<2x24xf32> to vector<2x8xf32>
    %145 = vector.extract_strided_slice %142 {offsets = [0, 8], sizes = [2, 8], strides = [1, 1]} : vector<2x24xf32> to vector<2x8xf32>
    %146 = vector.extract_strided_slice %142 {offsets = [0, 16], sizes = [2, 8], strides = [1, 1]} : vector<2x24xf32> to vector<2x8xf32>
    %147 = arith.mulf %145, %110 : vector<2x8xf32>
    %148 = arith.mulf %144, %143 : vector<2x8xf32>
    %149 = arith.addf %147, %148 : vector<2x8xf32>
    %150 = math.tanh %149 : vector<2x8xf32>
    %151 = arith.mulf %146, %150 : vector<2x8xf32>
    %cst_37 = arith.constant dense<0.000000e+00> : vector<2x32xf32>
    %152 = tpu.matmul %151, %1, %cst_37 {dimension_numbers = #tpu.dot_dimension_numbers<[1], [0], [0], [1], [0, 0, 1, 1], [], []>} : vector<2x8xf32>, vector<8x32xf32>, vector<2x32xf32> -> vector<2x32xf32>
    %cst_38 = arith.constant dense<0.000000e+00> : vector<2x32xf32>
    %153 = tpu.matmul %132, %2, %cst_38 {dimension_numbers = #tpu.dot_dimension_numbers<[1], [0], [0], [1], [0, 0, 1, 1], [], []>} : vector<2x8xf32>, vector<8x32xf32>, vector<2x32xf32> -> vector<2x32xf32>
    %154 = arith.addf %152, %153 : vector<2x32xf32>
    %155 = vector.broadcast %3 : vector<1x32xf32> to vector<2x32xf32>
    %156 = arith.addf %154, %155 : vector<2x32xf32>
    %157 = math.tanh %156 : vector<2x32xf32>
    %158 = vector.extract_strided_slice %157 {offsets = [0, 0], sizes = [2, 24], strides = [1, 1]} : vector<2x32xf32> to vector<2x24xf32>
    %cst_39 = arith.constant 5.000000e-01 : f32
    %159 = vector.broadcast %cst_39 : f32 to vector<2x24xf32>
    %160 = arith.mulf %159, %158 : vector<2x24xf32>
    %cst_40 = arith.constant 5.000000e-01 : f32
    %161 = vector.broadcast %cst_40 : f32 to vector<2x24xf32>
    %162 = arith.addf %160, %161 : vector<2x24xf32>
    %163 = vector.extract_strided_slice %157 {offsets = [0, 24], sizes = [2, 8], strides = [1, 1]} : vector<2x32xf32> to vector<2x8xf32>
    %164 = vector.extract_strided_slice %162 {offsets = [0, 0], sizes = [2, 8], strides = [1, 1]} : vector<2x24xf32> to vector<2x8xf32>
    %165 = vector.extract_strided_slice %162 {offsets = [0, 8], sizes = [2, 8], strides = [1, 1]} : vector<2x24xf32> to vector<2x8xf32>
    %166 = vector.extract_strided_slice %162 {offsets = [0, 16], sizes = [2, 8], strides = [1, 1]} : vector<2x24xf32> to vector<2x8xf32>
    %167 = arith.mulf %165, %130 : vector<2x8xf32>
    %168 = arith.mulf %164, %163 : vector<2x8xf32>
    %169 = arith.addf %167, %168 : vector<2x8xf32>
    %170 = math.tanh %169 : vector<2x8xf32>
    %171 = arith.mulf %166, %170 : vector<2x8xf32>
    %172 = vector.extract_strided_slice %14 {offsets = [0, 4, 0], sizes = [2, 1, 32], strides = [1, 1, 1]} : vector<2x8x32xf32> to vector<2x1x32xf32>
    %173 = vector.shape_cast %172 : vector<2x1x32xf32> to vector<2x32xf32>
    %cst_41 = arith.constant dense<0.000000e+00> : vector<2x32xf32>
    %174 = tpu.matmul %151, %0, %cst_41 {dimension_numbers = #tpu.dot_dimension_numbers<[1], [0], [0], [1], [0, 0, 1, 1], [], []>} : vector<2x8xf32>, vector<8x32xf32>, vector<2x32xf32> -> vector<2x32xf32>
    %175 = arith.addf %173, %174 : vector<2x32xf32>
    %176 = math.tanh %175 : vector<2x32xf32>
    %177 = vector.extract_strided_slice %176 {offsets = [0, 0], sizes = [2, 24], strides = [1, 1]} : vector<2x32xf32> to vector<2x24xf32>
    %cst_42 = arith.constant 5.000000e-01 : f32
    %178 = vector.broadcast %cst_42 : f32 to vector<2x24xf32>
    %179 = arith.mulf %178, %177 : vector<2x24xf32>
    %cst_43 = arith.constant 5.000000e-01 : f32
    %180 = vector.broadcast %cst_43 : f32 to vector<2x24xf32>
    %181 = arith.addf %179, %180 : vector<2x24xf32>
    %182 = vector.extract_strided_slice %176 {offsets = [0, 24], sizes = [2, 8], strides = [1, 1]} : vector<2x32xf32> to vector<2x8xf32>
    %183 = vector.extract_strided_slice %181 {offsets = [0, 0], sizes = [2, 8], strides = [1, 1]} : vector<2x24xf32> to vector<2x8xf32>
    %184 = vector.extract_strided_slice %181 {offsets = [0, 8], sizes = [2, 8], strides = [1, 1]} : vector<2x24xf32> to vector<2x8xf32>
    %185 = vector.extract_strided_slice %181 {offsets = [0, 16], sizes = [2, 8], strides = [1, 1]} : vector<2x24xf32> to vector<2x8xf32>
    %186 = arith.mulf %184, %149 : vector<2x8xf32>
    %187 = arith.mulf %183, %182 : vector<2x8xf32>
    %188 = arith.addf %186, %187 : vector<2x8xf32>
    %189 = math.tanh %188 : vector<2x8xf32>
    %190 = arith.mulf %185, %189 : vector<2x8xf32>
    %cst_44 = arith.constant dense<0.000000e+00> : vector<2x32xf32>
    %191 = tpu.matmul %190, %1, %cst_44 {dimension_numbers = #tpu.dot_dimension_numbers<[1], [0], [0], [1], [0, 0, 1, 1], [], []>} : vector<2x8xf32>, vector<8x32xf32>, vector<2x32xf32> -> vector<2x32xf32>
    %cst_45 = arith.constant dense<0.000000e+00> : vector<2x32xf32>
    %192 = tpu.matmul %171, %2, %cst_45 {dimension_numbers = #tpu.dot_dimension_numbers<[1], [0], [0], [1], [0, 0, 1, 1], [], []>} : vector<2x8xf32>, vector<8x32xf32>, vector<2x32xf32> -> vector<2x32xf32>
    %193 = arith.addf %191, %192 : vector<2x32xf32>
    %194 = vector.broadcast %3 : vector<1x32xf32> to vector<2x32xf32>
    %195 = arith.addf %193, %194 : vector<2x32xf32>
    %196 = math.tanh %195 : vector<2x32xf32>
    %197 = vector.extract_strided_slice %196 {offsets = [0, 0], sizes = [2, 24], strides = [1, 1]} : vector<2x32xf32> to vector<2x24xf32>
    %cst_46 = arith.constant 5.000000e-01 : f32
    %198 = vector.broadcast %cst_46 : f32 to vector<2x24xf32>
    %199 = arith.mulf %198, %197 : vector<2x24xf32>
    %cst_47 = arith.constant 5.000000e-01 : f32
    %200 = vector.broadcast %cst_47 : f32 to vector<2x24xf32>
    %201 = arith.addf %199, %200 : vector<2x24xf32>
    %202 = vector.extract_strided_slice %196 {offsets = [0, 24], sizes = [2, 8], strides = [1, 1]} : vector<2x32xf32> to vector<2x8xf32>
    %203 = vector.extract_strided_slice %201 {offsets = [0, 0], sizes = [2, 8], strides = [1, 1]} : vector<2x24xf32> to vector<2x8xf32>
    %204 = vector.extract_strided_slice %201 {offsets = [0, 8], sizes = [2, 8], strides = [1, 1]} : vector<2x24xf32> to vector<2x8xf32>
    %205 = vector.extract_strided_slice %201 {offsets = [0, 16], sizes = [2, 8], strides = [1, 1]} : vector<2x24xf32> to vector<2x8xf32>
    %206 = arith.mulf %204, %169 : vector<2x8xf32>
    %207 = arith.mulf %203, %202 : vector<2x8xf32>
    %208 = arith.addf %206, %207 : vector<2x8xf32>
    %209 = math.tanh %208 : vector<2x8xf32>
    %210 = arith.mulf %205, %209 : vector<2x8xf32>
    %211 = vector.extract_strided_slice %14 {offsets = [0, 5, 0], sizes = [2, 1, 32], strides = [1, 1, 1]} : vector<2x8x32xf32> to vector<2x1x32xf32>
    %212 = vector.shape_cast %211 : vector<2x1x32xf32> to vector<2x32xf32>
    %cst_48 = arith.constant dense<0.000000e+00> : vector<2x32xf32>
    %213 = tpu.matmul %190, %0, %cst_48 {dimension_numbers = #tpu.dot_dimension_numbers<[1], [0], [0], [1], [0, 0, 1, 1], [], []>} : vector<2x8xf32>, vector<8x32xf32>, vector<2x32xf32> -> vector<2x32xf32>
    %214 = arith.addf %212, %213 : vector<2x32xf32>
    %215 = math.tanh %214 : vector<2x32xf32>
    %216 = vector.extract_strided_slice %215 {offsets = [0, 0], sizes = [2, 24], strides = [1, 1]} : vector<2x32xf32> to vector<2x24xf32>
    %cst_49 = arith.constant 5.000000e-01 : f32
    %217 = vector.broadcast %cst_49 : f32 to vector<2x24xf32>
    %218 = arith.mulf %217, %216 : vector<2x24xf32>
    %cst_50 = arith.constant 5.000000e-01 : f32
    %219 = vector.broadcast %cst_50 : f32 to vector<2x24xf32>
    %220 = arith.addf %218, %219 : vector<2x24xf32>
    %221 = vector.extract_strided_slice %215 {offsets = [0, 24], sizes = [2, 8], strides = [1, 1]} : vector<2x32xf32> to vector<2x8xf32>
    %222 = vector.extract_strided_slice %220 {offsets = [0, 0], sizes = [2, 8], strides = [1, 1]} : vector<2x24xf32> to vector<2x8xf32>
    %223 = vector.extract_strided_slice %220 {offsets = [0, 8], sizes = [2, 8], strides = [1, 1]} : vector<2x24xf32> to vector<2x8xf32>
    %224 = vector.extract_strided_slice %220 {offsets = [0, 16], sizes = [2, 8], strides = [1, 1]} : vector<2x24xf32> to vector<2x8xf32>
    %225 = arith.mulf %223, %188 : vector<2x8xf32>
    %226 = arith.mulf %222, %221 : vector<2x8xf32>
    %227 = arith.addf %225, %226 : vector<2x8xf32>
    %228 = math.tanh %227 : vector<2x8xf32>
    %229 = arith.mulf %224, %228 : vector<2x8xf32>
    %cst_51 = arith.constant dense<0.000000e+00> : vector<2x32xf32>
    %230 = tpu.matmul %229, %1, %cst_51 {dimension_numbers = #tpu.dot_dimension_numbers<[1], [0], [0], [1], [0, 0, 1, 1], [], []>} : vector<2x8xf32>, vector<8x32xf32>, vector<2x32xf32> -> vector<2x32xf32>
    %cst_52 = arith.constant dense<0.000000e+00> : vector<2x32xf32>
    %231 = tpu.matmul %210, %2, %cst_52 {dimension_numbers = #tpu.dot_dimension_numbers<[1], [0], [0], [1], [0, 0, 1, 1], [], []>} : vector<2x8xf32>, vector<8x32xf32>, vector<2x32xf32> -> vector<2x32xf32>
    %232 = arith.addf %230, %231 : vector<2x32xf32>
    %233 = vector.broadcast %3 : vector<1x32xf32> to vector<2x32xf32>
    %234 = arith.addf %232, %233 : vector<2x32xf32>
    %235 = math.tanh %234 : vector<2x32xf32>
    %236 = vector.extract_strided_slice %235 {offsets = [0, 0], sizes = [2, 24], strides = [1, 1]} : vector<2x32xf32> to vector<2x24xf32>
    %cst_53 = arith.constant 5.000000e-01 : f32
    %237 = vector.broadcast %cst_53 : f32 to vector<2x24xf32>
    %238 = arith.mulf %237, %236 : vector<2x24xf32>
    %cst_54 = arith.constant 5.000000e-01 : f32
    %239 = vector.broadcast %cst_54 : f32 to vector<2x24xf32>
    %240 = arith.addf %238, %239 : vector<2x24xf32>
    %241 = vector.extract_strided_slice %235 {offsets = [0, 24], sizes = [2, 8], strides = [1, 1]} : vector<2x32xf32> to vector<2x8xf32>
    %242 = vector.extract_strided_slice %240 {offsets = [0, 0], sizes = [2, 8], strides = [1, 1]} : vector<2x24xf32> to vector<2x8xf32>
    %243 = vector.extract_strided_slice %240 {offsets = [0, 8], sizes = [2, 8], strides = [1, 1]} : vector<2x24xf32> to vector<2x8xf32>
    %244 = vector.extract_strided_slice %240 {offsets = [0, 16], sizes = [2, 8], strides = [1, 1]} : vector<2x24xf32> to vector<2x8xf32>
    %245 = arith.mulf %243, %208 : vector<2x8xf32>
    %246 = arith.mulf %242, %241 : vector<2x8xf32>
    %247 = arith.addf %245, %246 : vector<2x8xf32>
    %248 = math.tanh %247 : vector<2x8xf32>
    %249 = arith.mulf %244, %248 : vector<2x8xf32>
    %250 = vector.extract_strided_slice %14 {offsets = [0, 6, 0], sizes = [2, 1, 32], strides = [1, 1, 1]} : vector<2x8x32xf32> to vector<2x1x32xf32>
    %251 = vector.shape_cast %250 : vector<2x1x32xf32> to vector<2x32xf32>
    %cst_55 = arith.constant dense<0.000000e+00> : vector<2x32xf32>
    %252 = tpu.matmul %229, %0, %cst_55 {dimension_numbers = #tpu.dot_dimension_numbers<[1], [0], [0], [1], [0, 0, 1, 1], [], []>} : vector<2x8xf32>, vector<8x32xf32>, vector<2x32xf32> -> vector<2x32xf32>
    %253 = arith.addf %251, %252 : vector<2x32xf32>
    %254 = math.tanh %253 : vector<2x32xf32>
    %255 = vector.extract_strided_slice %254 {offsets = [0, 0], sizes = [2, 24], strides = [1, 1]} : vector<2x32xf32> to vector<2x24xf32>
    %cst_56 = arith.constant 5.000000e-01 : f32
    %256 = vector.broadcast %cst_56 : f32 to vector<2x24xf32>
    %257 = arith.mulf %256, %255 : vector<2x24xf32>
    %cst_57 = arith.constant 5.000000e-01 : f32
    %258 = vector.broadcast %cst_57 : f32 to vector<2x24xf32>
    %259 = arith.addf %257, %258 : vector<2x24xf32>
    %260 = vector.extract_strided_slice %254 {offsets = [0, 24], sizes = [2, 8], strides = [1, 1]} : vector<2x32xf32> to vector<2x8xf32>
    %261 = vector.extract_strided_slice %259 {offsets = [0, 0], sizes = [2, 8], strides = [1, 1]} : vector<2x24xf32> to vector<2x8xf32>
    %262 = vector.extract_strided_slice %259 {offsets = [0, 8], sizes = [2, 8], strides = [1, 1]} : vector<2x24xf32> to vector<2x8xf32>
    %263 = vector.extract_strided_slice %259 {offsets = [0, 16], sizes = [2, 8], strides = [1, 1]} : vector<2x24xf32> to vector<2x8xf32>
    %264 = arith.mulf %262, %227 : vector<2x8xf32>
    %265 = arith.mulf %261, %260 : vector<2x8xf32>
    %266 = arith.addf %264, %265 : vector<2x8xf32>
    %267 = math.tanh %266 : vector<2x8xf32>
    %268 = arith.mulf %263, %267 : vector<2x8xf32>
    %cst_58 = arith.constant dense<0.000000e+00> : vector<2x32xf32>
    %269 = tpu.matmul %268, %1, %cst_58 {dimension_numbers = #tpu.dot_dimension_numbers<[1], [0], [0], [1], [0, 0, 1, 1], [], []>} : vector<2x8xf32>, vector<8x32xf32>, vector<2x32xf32> -> vector<2x32xf32>
    %cst_59 = arith.constant dense<0.000000e+00> : vector<2x32xf32>
    %270 = tpu.matmul %249, %2, %cst_59 {dimension_numbers = #tpu.dot_dimension_numbers<[1], [0], [0], [1], [0, 0, 1, 1], [], []>} : vector<2x8xf32>, vector<8x32xf32>, vector<2x32xf32> -> vector<2x32xf32>
    %271 = arith.addf %269, %270 : vector<2x32xf32>
    %272 = vector.broadcast %3 : vector<1x32xf32> to vector<2x32xf32>
    %273 = arith.addf %271, %272 : vector<2x32xf32>
    %274 = math.tanh %273 : vector<2x32xf32>
    %275 = vector.extract_strided_slice %274 {offsets = [0, 0], sizes = [2, 24], strides = [1, 1]} : vector<2x32xf32> to vector<2x24xf32>
    %cst_60 = arith.constant 5.000000e-01 : f32
    %276 = vector.broadcast %cst_60 : f32 to vector<2x24xf32>
    %277 = arith.mulf %276, %275 : vector<2x24xf32>
    %cst_61 = arith.constant 5.000000e-01 : f32
    %278 = vector.broadcast %cst_61 : f32 to vector<2x24xf32>
    %279 = arith.addf %277, %278 : vector<2x24xf32>
    %280 = vector.extract_strided_slice %274 {offsets = [0, 24], sizes = [2, 8], strides = [1, 1]} : vector<2x32xf32> to vector<2x8xf32>
    %281 = vector.extract_strided_slice %279 {offsets = [0, 0], sizes = [2, 8], strides = [1, 1]} : vector<2x24xf32> to vector<2x8xf32>
    %282 = vector.extract_strided_slice %279 {offsets = [0, 8], sizes = [2, 8], strides = [1, 1]} : vector<2x24xf32> to vector<2x8xf32>
    %283 = vector.extract_strided_slice %279 {offsets = [0, 16], sizes = [2, 8], strides = [1, 1]} : vector<2x24xf32> to vector<2x8xf32>
    %284 = arith.mulf %282, %247 : vector<2x8xf32>
    %285 = arith.mulf %281, %280 : vector<2x8xf32>
    %286 = arith.addf %284, %285 : vector<2x8xf32>
    %287 = math.tanh %286 : vector<2x8xf32>
    %288 = arith.mulf %283, %287 : vector<2x8xf32>
    %289 = vector.extract_strided_slice %14 {offsets = [0, 7, 0], sizes = [2, 1, 32], strides = [1, 1, 1]} : vector<2x8x32xf32> to vector<2x1x32xf32>
    %290 = vector.shape_cast %289 : vector<2x1x32xf32> to vector<2x32xf32>
    %cst_62 = arith.constant dense<0.000000e+00> : vector<2x32xf32>
    %291 = tpu.matmul %268, %0, %cst_62 {dimension_numbers = #tpu.dot_dimension_numbers<[1], [0], [0], [1], [0, 0, 1, 1], [], []>} : vector<2x8xf32>, vector<8x32xf32>, vector<2x32xf32> -> vector<2x32xf32>
    %292 = arith.addf %290, %291 : vector<2x32xf32>
    %293 = math.tanh %292 : vector<2x32xf32>
    %294 = vector.extract_strided_slice %293 {offsets = [0, 0], sizes = [2, 24], strides = [1, 1]} : vector<2x32xf32> to vector<2x24xf32>
    %cst_63 = arith.constant 5.000000e-01 : f32
    %295 = vector.broadcast %cst_63 : f32 to vector<2x24xf32>
    %296 = arith.mulf %295, %294 : vector<2x24xf32>
    %cst_64 = arith.constant 5.000000e-01 : f32
    %297 = vector.broadcast %cst_64 : f32 to vector<2x24xf32>
    %298 = arith.addf %296, %297 : vector<2x24xf32>
    %299 = vector.extract_strided_slice %293 {offsets = [0, 24], sizes = [2, 8], strides = [1, 1]} : vector<2x32xf32> to vector<2x8xf32>
    %300 = vector.extract_strided_slice %298 {offsets = [0, 0], sizes = [2, 8], strides = [1, 1]} : vector<2x24xf32> to vector<2x8xf32>
    %301 = vector.extract_strided_slice %298 {offsets = [0, 8], sizes = [2, 8], strides = [1, 1]} : vector<2x24xf32> to vector<2x8xf32>
    %302 = vector.extract_strided_slice %298 {offsets = [0, 16], sizes = [2, 8], strides = [1, 1]} : vector<2x24xf32> to vector<2x8xf32>
    %303 = arith.mulf %301, %266 : vector<2x8xf32>
    %304 = arith.mulf %300, %299 : vector<2x8xf32>
    %305 = arith.addf %303, %304 : vector<2x8xf32>
    %306 = math.tanh %305 : vector<2x8xf32>
    %307 = arith.mulf %302, %306 : vector<2x8xf32>
    %cst_65 = arith.constant dense<0.000000e+00> : vector<2x32xf32>
    %308 = tpu.matmul %307, %1, %cst_65 {dimension_numbers = #tpu.dot_dimension_numbers<[1], [0], [0], [1], [0, 0, 1, 1], [], []>} : vector<2x8xf32>, vector<8x32xf32>, vector<2x32xf32> -> vector<2x32xf32>
    %cst_66 = arith.constant dense<0.000000e+00> : vector<2x32xf32>
    %309 = tpu.matmul %288, %2, %cst_66 {dimension_numbers = #tpu.dot_dimension_numbers<[1], [0], [0], [1], [0, 0, 1, 1], [], []>} : vector<2x8xf32>, vector<8x32xf32>, vector<2x32xf32> -> vector<2x32xf32>
    %310 = arith.addf %308, %309 : vector<2x32xf32>
    %311 = vector.broadcast %3 : vector<1x32xf32> to vector<2x32xf32>
    %312 = arith.addf %310, %311 : vector<2x32xf32>
    %313 = math.tanh %312 : vector<2x32xf32>
    %314 = vector.extract_strided_slice %313 {offsets = [0, 0], sizes = [2, 24], strides = [1, 1]} : vector<2x32xf32> to vector<2x24xf32>
    %cst_67 = arith.constant 5.000000e-01 : f32
    %315 = vector.broadcast %cst_67 : f32 to vector<2x24xf32>
    %316 = arith.mulf %315, %314 : vector<2x24xf32>
    %cst_68 = arith.constant 5.000000e-01 : f32
    %317 = vector.broadcast %cst_68 : f32 to vector<2x24xf32>
    %318 = arith.addf %316, %317 : vector<2x24xf32>
    %319 = vector.extract_strided_slice %313 {offsets = [0, 24], sizes = [2, 8], strides = [1, 1]} : vector<2x32xf32> to vector<2x8xf32>
    %320 = vector.extract_strided_slice %318 {offsets = [0, 0], sizes = [2, 8], strides = [1, 1]} : vector<2x24xf32> to vector<2x8xf32>
    %321 = vector.extract_strided_slice %318 {offsets = [0, 8], sizes = [2, 8], strides = [1, 1]} : vector<2x24xf32> to vector<2x8xf32>
    %322 = vector.extract_strided_slice %318 {offsets = [0, 16], sizes = [2, 8], strides = [1, 1]} : vector<2x24xf32> to vector<2x8xf32>
    %323 = arith.mulf %321, %286 : vector<2x8xf32>
    %324 = arith.mulf %320, %319 : vector<2x8xf32>
    %325 = arith.addf %323, %324 : vector<2x8xf32>
    %326 = math.tanh %325 : vector<2x8xf32>
    %327 = arith.mulf %322, %326 : vector<2x8xf32>
    %c0_69 = arith.constant 0 : index
    %c0_70 = arith.constant 0 : index
    %328 = vector.load %arg8[%c0_69, %c0_70] : memref<8x1xf32, #tpu.memory_space<vmem>>, vector<8x1xf32>
    %cst_71 = arith.constant dense<0.000000e+00> : vector<2x1xf32>
    %329 = tpu.matmul %327, %328, %cst_71 {dimension_numbers = #tpu.dot_dimension_numbers<[1], [0], [0], [1], [0, 0, 1, 1], [], []>} : vector<2x8xf32>, vector<8x1xf32>, vector<2x1xf32> -> vector<2x1xf32>
    %c0_72 = arith.constant 0 : index
    %c0_73 = arith.constant 0 : index
    %330 = vector.load %arg9[%c0_72, %c0_73] : memref<1x1xf32, #tpu.memory_space<vmem>>, vector<1x1xf32>
    %331 = vector.broadcast %330 : vector<1x1xf32> to vector<2x1xf32>
    %332 = arith.addf %329, %331 : vector<2x1xf32>
    %c0_74 = arith.constant 0 : index
    %c0_75 = arith.constant 0 : index
    %333 = vector.load %arg10[%c0_74, %c0_75] : memref<2x1xf32, #tpu.memory_space<vmem>>, vector<2x1xf32>
    tpu.vector_store %arg10[%c0_74, %c0_75], %332 {strides = array<i32>} : memref<2x1xf32, #tpu.memory_space<vmem>>, vector<2x1xf32>,
    %334 = vector.shape_cast %307 : vector<2x8xf32> to vector<1x2x8xf32>
    %335 = vector.shape_cast %327 : vector<2x8xf32> to vector<1x2x8xf32>
    %336 = tpu.concatenate %334, %335 in 0 : vector<1x2x8xf32>, vector<1x2x8xf32> -> vector<2x2x8xf32>
    %c0_76 = arith.constant 0 : index
    %c0_77 = arith.constant 0 : index
    %c0_78 = arith.constant 0 : index
    %337 = vector.load %arg11[%c0_76, %c0_77, %c0_78] : memref<2x2x8xf32, #tpu.memory_space<vmem>>, vector<2x2x8xf32>
    tpu.vector_store %arg11[%c0_76, %c0_77, %c0_78], %336 {strides = array<i32>} : memref<2x2x8xf32, #tpu.memory_space<vmem>>, vector<2x2x8xf32>,
    %338 = vector.shape_cast %305 : vector<2x8xf32> to vector<1x2x8xf32>
    %339 = vector.shape_cast %325 : vector<2x8xf32> to vector<1x2x8xf32>
    %340 = tpu.concatenate %338, %339 in 0 : vector<1x2x8xf32>, vector<1x2x8xf32> -> vector<2x2x8xf32>
    %c0_79 = arith.constant 0 : index
    %c0_80 = arith.constant 0 : index
    %c0_81 = arith.constant 0 : index
    %341 = vector.load %arg12[%c0_79, %c0_80, %c0_81] : memref<2x2x8xf32, #tpu.memory_space<vmem>>, vector<2x2x8xf32>
    tpu.vector_store %arg12[%c0_79, %c0_80, %c0_81], %340 {strides = array<i32>} : memref<2x2x8xf32, #tpu.memory_space<vmem>>, vector<2x2x8xf32>,
    return
  }
  func.func @transform_0(%arg0: i32) -> (i32, i32) {
    %c0_i32 = arith.constant 0 : i32
    %c0_i32_0 = arith.constant 0 : i32
    return %arg0, %c0_i32 : i32, i32
  }
  func.func @transform_1(%arg0: i32) -> (i32, i32) {
    %c0_i32 = arith.constant 0 : i32
    %c0_i32_0 = arith.constant 0 : i32
    %c0_i32_1 = arith.constant 0 : i32
    return %c0_i32, %c0_i32_0 : i32, i32
  }
  func.func @transform_2(%arg0: i32) -> (i32, i32) {
    %c0_i32 = arith.constant 0 : i32
    %c0_i32_0 = arith.constant 0 : i32
    %c0_i32_1 = arith.constant 0 : i32
    return %c0_i32, %c0_i32_0 : i32, i32
  }
  func.func @transform_3(%arg0: i32) -> (i32, i32) {
    %c0_i32 = arith.constant 0 : i32
    %c0_i32_0 = arith.constant 0 : i32
    %c0_i32_1 = arith.constant 0 : i32
    return %c0_i32, %c0_i32_0 : i32, i32
  }
  func.func @transform_4(%arg0: i32) -> (i32, i32) {
    %c0_i32 = arith.constant 0 : i32
    %c0_i32_0 = arith.constant 0 : i32
    %c0_i32_1 = arith.constant 0 : i32
    return %c0_i32, %c0_i32_0 : i32, i32
  }
  func.func @transform_5(%arg0: i32) -> (i32, i32) {
    %c0_i32 = arith.constant 0 : i32
    %c0_i32_0 = arith.constant 0 : i32
    %c0_i32_1 = arith.constant 0 : i32
    return %c0_i32, %c0_i32_0 : i32, i32
  }
  func.func @transform_6(%arg0: i32) -> (i32, i32) {
    %c0_i32 = arith.constant 0 : i32
    %c0_i32_0 = arith.constant 0 : i32
    %c0_i32_1 = arith.constant 0 : i32
    return %c0_i32, %c0_i32_0 : i32, i32
  }
  func.func @transform_7(%arg0: i32) -> (i32, i32) {
    %c0_i32 = arith.constant 0 : i32
    %c0_i32_0 = arith.constant 0 : i32
    %c0_i32_1 = arith.constant 0 : i32
    return %c0_i32, %c0_i32_0 : i32, i32
  }
  func.func @transform_8(%arg0: i32) -> (i32, i32) {
    %c0_i32 = arith.constant 0 : i32
    %c0_i32_0 = arith.constant 0 : i32
    %c0_i32_1 = arith.constant 0 : i32
    return %c0_i32, %c0_i32_0 : i32, i32
  }
  func.func @transform_9(%arg0: i32) -> (i32, i32) {
    %c0_i32 = arith.constant 0 : i32
    %c0_i32_0 = arith.constant 0 : i32
    return %arg0, %c0_i32 : i32, i32
  }
  func.func @transform_10(%arg0: i32) -> (i32, i32, i32) {
    %c0_i32 = arith.constant 0 : i32
    %c0_i32_0 = arith.constant 0 : i32
    %c0_i32_1 = arith.constant 0 : i32
    return %c0_i32, %arg0, %c0_i32_0 : i32, i32, i32
  }
  func.func @transform_11(%arg0: i32) -> (i32, i32, i32) {
    %c0_i32 = arith.constant 0 : i32
    %c0_i32_0 = arith.constant 0 : i32
    %c0_i32_1 = arith.constant 0 : i32
    return %c0_i32, %arg0, %c0_i32_0 : i32, i32, i32
  }
}

</mosaic_0001>

<bundles_post_ra>
// kernel: tpu_custom_call.1
= control target key start
LH: loop header
LB: loop body
LE: loop exit
PB: predicated region body
PF: predicated region fallthrough
CT: control target
= control target key end

     0   :  { %s3583_s0 = inlined_call_operand.hbm [shape: f32[2,8], index: 0, kind: input, shape index: {}]   ;;  %s3584_s1 = inlined_call_operand.hbm [shape: f32[1,32], index: 1, kind: input, shape index: {}]   ;;  %s3585_s2 = inlined_call_operand.vmem [shape: f32[8,32], index: 2, kind: input, shape index: {}]   ;;  %s3586_s3 = inlined_call_operand.hbm [shape: f32[1,32], index: 3, kind: input, shape index: {}]   ;;  %s3587_s4 = inlined_call_operand.vmem [shape: f32[8,32], index: 4, kind: input, shape index: {}]   ;;  %s3588_s5 = inlined_call_operand.hbm [shape: f32[8,32], index: 5, kind: input, shape index: {}]   ;;  %s3589_s6 = inlined_call_operand.vmem [shape: f32[1,32], index: 6, kind: input, shape index: {}]   ;;  %s3590_s7 = inlined_call_operand.vmem [shape: f32[8,1], index: 7, kind: input, shape index: {}]   ;;  %s3591_s8 = inlined_call_operand.<no memory space> [shape: f32[1,1], index: 8, kind: input, shape index: {}]   ;;  %s3592_s9 = inlined_call_operand.vmem [shape: f32[2,1], index: 9, kind: output, shape index: {0}]   ;;  %s3593_s10 = inlined_call_operand.hbm [shape: f32[2,2,8], index: 10, kind: output, shape index: {1}]   ;;  %s3594_s11 = inlined_call_operand.hbm [shape: f32[2,2,8], index: 11, kind: output, shape index: {2}]  }
   0x1   :  { %v17_v0 = vstv %s3591_s8 }
   0x2   :  { %18 = vst [vmem:[#allocation2] sm:$0x1] %v17_v0 }
   0x3   :  { %19 = vsyncpa [#allocation4], 0 }
   0x4   :  { %20 = vsyncpa [#allocation7], 0 }
   0x5   :  { %21 = vsyncpa [#allocation10], 0 }
   0x6   :  { %22 = vsyncpa [#allocation5], 0 }
   0x7   :  { %23 = vsyncpa [#allocation13], 0  ;;  %s3120_s19 = smov [#allocation6]   ;;  %s3121_s21 = smov [#allocation3]  }
   0x8   :  { %s40_s20 = sshll.u32 %s3120_s19, 4  ;;  %s30_s22 = sshll.u32 %s3121_s21, 4  ;;  %s41_s20 = int_to_ptr.vmem [resolvable:$true] %s40_s20  ;;  %s31_s22 = int_to_ptr.vmem [resolvable:$true] %s30_s22 }
   0x9   :  { %s2998_s23 = scalar_lea.vmem %s41_s20, 16  ;;  %s3002_s24 = scalar_lea.vmem %s41_s20, 32 }
   0xa   :  { %p2999_p0 = scmp.ne.s32.totalorder %s41_s20, %s2998_s23  ;;  %p3003_p1 = scmp.lt.s32.totalorder %s41_s20, %s41_s20 }
   0xb   :  { %p3004_p2 = scmp.lt.s32.totalorder %s3002_s24, %s2998_s23 }
   0xd   :  { %p3005_p3 = por %p3004_p2, %p3003_p1 }
   0xf   :  { %p3006_p4 = pnand %p3005_p3, %p2999_p0 }
  0x11   :  { %3009 = shalt.err (!%p3006_p4)
}
  0x12   :  { %43 = dma.hbm_to_vmem [thread:$0]  %s3584_s1, 16, %s41_s20, [#allocation7]  }
  0x13   :  { %s3018_s26 = scalar_lea.vmem %s31_s22, 32  ;;  %p3023_p6 = scmp.lt.s32.totalorder %s31_s22, %s31_s22 }
  0x14   :  { %p3019_p5 = scmp.ne.s32.totalorder %s31_s22, %s3018_s26  ;;  %p3024_p7 = scmp.lt.s32.totalorder %s3018_s26, %s3018_s26 }
  0x16   :  { %p3025_p8 = por %p3024_p7, %p3023_p6 }
  0x18   :  { %p3026_p9 = pnand %p3025_p8, %p3019_p5 }
  0x1a   :  { %3029 = shalt.err (!%p3026_p9)
}
  0x1b   :  { %33 = dma.hbm_to_vmem [thread:$0]  %s3583_s0, 32, %s31_s22, [#allocation4]  }
  0x1c   :  { %s3122_s29 = smov [#allocation8]   ;;  %s3123_s12 = smov [#allocation9]  }
  0x1d   :  { %s52_s30 = sshll.u32 %s3122_s29, 4  ;;  %s64_s13 = sshll.u32 %s3123_s12, 4  ;;  %s53_s30 = int_to_ptr.vmem [resolvable:$true] %s52_s30  ;;  %s65_s13 = int_to_ptr.vmem [resolvable:$true] %s64_s13 }
  0x1e   :  { %s3038_s14 = scalar_lea.vmem %s53_s30, 16  ;;  %s3042_s1 = scalar_lea.vmem %s53_s30, 32 }
  0x1f   :  { %p3039_p10 = scmp.ne.s32.totalorder %s53_s30, %s3038_s14  ;;  %p3043_p11 = scmp.lt.s32.totalorder %s53_s30, %s53_s30 }
  0x20   :  { %p3044_p12 = scmp.lt.s32.totalorder %s3042_s1, %s3038_s14 }
  0x22   :  { %p3045_p13 = por %p3044_p12, %p3043_p11 }
  0x24   :  { %p3046_p0 = pnand %p3045_p13, %p3039_p10 }
  0x26   :  { %3049 = shalt.err (!%p3046_p0)
}
  0x27   :  { %55 = dma.hbm_to_vmem [thread:$0]  %s3586_s3, 16, %s53_s30, [#allocation7]  }
  0x28   :  { %s3058_s17 = scalar_lea.vmem %s65_s13, 128  ;;  %p3063_p2 = scmp.lt.s32.totalorder %s65_s13, %s65_s13 }
  0x29   :  { %p3059_p1 = scmp.ne.s32.totalorder %s65_s13, %s3058_s17  ;;  %p3064_p3 = scmp.lt.s32.totalorder %s3058_s17, %s3058_s17 }
  0x2b   :  { %p3065_p4 = por %p3064_p3, %p3063_p2 }
  0x2d   :  { %p3066_p5 = pnand %p3065_p4, %p3059_p1 }
  0x2f   :  { %3069 = shalt.err (!%p3066_p5)
}
  0x30   :  { %67 = dma.hbm_to_vmem [thread:$0]  %s3588_s5, 128, %s65_s13, [#allocation10]  }
  0x31   :  { %3110 = dma.done.wait [#allocation4], 32  }
  0x32   :  { %3111 = vsyncadd [#allocation4], 4294967264 }
  0x33   :  { %3112 = dma.done.wait [#allocation7], 32  }
  0x34   :  { %3113 = vsyncadd [#allocation7], 4294967264 }
  0x35   :  { %3114 = dma.done.wait [#allocation10], 128  }
  0x36   :  { %3115 = vsyncadd [#allocation10], 4294967168  ;;  %v91_v1 = vlaneseq  ;;  %v3124_v2 = vmov 0.0   ;;  %vm3125_vm0 = vmmov 0   ;;  %v3218_v6 = vld [vmem:[%s3585_s2] sm:$0xff]  ;;  %s3126_s19 = smov 104  }
  0x37   :  { %2751 = vmatprep.subr.mxu0 %v3124_v2  ;;  %2753 = vmatprep.mubr.msk.f32.mxu0 %vm3125_vm0, %v3124_v2  ;;  %v90_v7 = vld [vmem:[#allocation3] sm:$0x3]  ;;  %v2672_v11 = vld [vmem:[#allocation6] ss:$0 sm:$0xff]  ;;  %v2673_v15 = vld [vmem:[#allocation8] ss:$0 sm:$0xff] }
  0x38   :  { %v92_v3 = vshrl.u32 %v91_v1, 7  ;;  %2756 = vmatprep.subr.mxu1 %v3124_v2  ;;  %2758 = vmatprep.mubr.msk.f32.mxu1 %vm3125_vm0, %v3124_v2  ;;  %s3127_s20 = smov 8   ;;  %v3241_v39 = vld [vmem:[#allocation9] sm:$0xff]  ;;  %vm316_vm1 = vcmask 1041409   ;;  %s3128_s23 = smov 112   ;;  %vm123_vm2 = vcmask 64512  }
  0x39   :  { %2752 = vmatpush3.msra.mxu0 %v3218_v6  ;;  %v3246_v40 = vld [vmem:[%s3587_s4] sm:$0xff]  ;;  %2757 = vmatpush3.msra.mxu1 %v3241_v39  ;;  %s3129_s30 = smov 120   ;;  %vm2604_vm3 = vcmask 64519   ;;  %vm2606_vm4 = vcmask 57344   ;;  %s3131_s13 = smov [#allocation12]  }
  0x3a   :  { %v100_v4 = vsub.s32 1, %v92_v3  ;;  %v93_v5 = vsub.s32 0, %v92_v3  ;;  %2754 = vmatmul.mubr.f32.vlgmr.msra.gmra.mxu0 %v3124_v2  ;;  %2761 = vmatprep.subr.mxu0 %v3124_v2  ;;  %v3274_v52 = vld [vmem:[%s3589_s6] ss:$0 sm:$0xff]  ;;  %s2652_s14 = sshll.u32 %s3131_s13, 4  ;;  %s2653_s14 = int_to_ptr.vmem [resolvable:$true] %s2652_s14 }
  0x3b   :  { %2763 = vmatprep.mubr.msk.f32.mxu0 %vm3125_vm0, %v3124_v2  ;;  %2762 = vmatpush3.msra.mxu0 %v3246_v40 }
  0x3c   :  { %v101_v8 = vrot.slane %v90_v7, %v100_v4  ;;  %v94_v9 = vrot.slane %v90_v7, %v93_v5  ;;  %2759 = vmatmul.mubr.f32.vlgmr.msra.gmra.mxu1 %v3124_v2  ;;  %2766 = vmatprep.subr.mxu1 %v3124_v2 }
  0x3d   :  { %2767 = vmatpush3.msra.mxu1 %v3218_v6  ;;  %2768 = vmatprep.mubr.msk.f32.mxu1 %vm3125_vm0, %v3124_v2 }
  0x3e   :  { %103 = vbcast.lane.b32.xlu0 %v101_v8, 256  ;;  %2771 = vmatprep.subr.mxu0 %v3124_v2 }
  0x3f   :  { %2776 = vmatprep.subr.mxu1 %v3124_v2 }
  0x42   :  { %96 = vbcast.lane.b32.xlu0 %v94_v9, 256 }
  0xb0   :  { %v104_v10 = vpop.permute.xlu0 %103 }
  0xb1   :  { %v113_v13 = vmul.f32 %v2672_v11, %v104_v10 }
  0xb3   :  { %v3225_v16 = vadd.f32 %v2673_v15, %v113_v13 }
  0xb4   :  { %v97_v12 = vpop.permute.xlu0 %96 }
  0xb5   :  { %v112_v14 = vmul.f32 %v2672_v11, %v97_v12 }
  0xb7   :  { %v3227_v18 = vadd.f32 %v2673_v15, %v112_v14 }
  0xfa   :  { %v193_v17 = vpop.f32.mrf.mxu0 }
  0xfb   :  { %v198_v19 = vrot.slane %v193_v17, 1  ;;  %v201_v22 = vadd.f32 %v193_v17, %v3227_v18 }
  0xfc   :  { %v2755_v20 = vpop.f32.mrf.mxu0  ;;  %v309_v49 = vpop.f32.mrf.mxu1 }
  0xfd   :  { %v202_v21 = vadd.f32 %v198_v19, %v3225_v16 }
  0xfe   :  { %v2760_v50 = vpop.f32.mrf.mxu1 }
  0xff   :  { %2890 = vtanh.f32 %v202_v21 }
 0x100   :  { %2892 = vtanh.f32 %v201_v22 }
 0x10c   :  { %v2891_v23 = vpop.eup %2890 }
 0x10d   :  { %215 = vrot.lane.b32.xlu1 %v2891_v23, %s3126_s19  ;;  %v2893_v24 = vpop.eup %2892  ;;  %v206_v25 = vmul.f32 0.5, %v2891_v23 }
 0x10e   :  { %v205_v27 = vmul.f32 0.5, %v2893_v24 }
 0x10f   :  { %v208_v26 = vadd.f32 0.5, %v206_v25 }
 0x110   :  { %v207_v30 = vadd.f32 0.5, %v205_v27 }
 0x111   :  { %213 = vrot.lane.b32.xlu1 %v2893_v24, %s3126_s19  ;;  %v210_v33 = vmul.f32 0.0, %v208_v26 }
 0x112   :  { %v209_v36 = vmul.f32 0.0, %v207_v30 }
 0x17f   :  { %v216_v28 = vpop.permute.xlu1 %215 }
 0x180   :  { %v220_v29 = vmul.f32 %v216_v28, %v208_v26 }
 0x182   :  { %225 = vrot.lane.b32.xlu0 %v220_v29, %s3127_s20 }
 0x183   :  { %v214_v31 = vpop.permute.xlu1 %213 }
 0x184   :  { %v219_v32 = vmul.f32 %v214_v31, %v207_v30 }
 0x186   :  { %223 = vrot.lane.b32.xlu1 %v219_v32, %s3127_s20 }
 0x1f4   :  { %v226_v34 = vpop.permute.xlu0 %225 }
 0x1f5   :  { %v3235_v35 = vadd.f32 %v226_v34, %v210_v33 }
 0x1f7   :  { %2894 = vtanh.f32 %v3235_v35  ;;  %v504_v21 = vrot.slane %v3235_v35, 7 }
 0x1f8   :  { %v224_v37 = vpop.permute.xlu1 %223 }
 0x1f9   :  { %v3238_v38 = vadd.f32 %v224_v37, %v209_v36 }
 0x1fb   :  { %2896 = vtanh.f32 %v3238_v38  ;;  %v503_v15 = vrot.slane %v3238_v38, 7 }
 0x204   :  { %v2895_v41 = vpop.eup %2894 }
 0x205   :  { %237 = vrot.lane.b32.xlu0 %v2895_v41, %s3127_s20 }
 0x208   :  { %v2897_v42 = vpop.eup %2896 }
 0x209   :  { %235 = vrot.lane.b32.xlu1 %v2897_v42, %s3127_s20 }
 0x277   :  { %v238_v43 = vpop.permute.xlu0 %237 }
 0x278   :  { %v242_v44 = vmul.f32 %v238_v43, %v208_v26 }
 0x27a   :  { %v315_v46 = vrot.slane %v242_v44, 7 }
 0x27b   :  { %v236_v45 = vpop.permute.xlu1 %235 }
 0x27c   :  { %v241_v47 = vmul.f32 %v236_v45, %v207_v30 }
 0x27e   :  { %v317_v48 = vsel %vm316_vm1, %v315_v46, %v241_v47 }
 0x27f   :  { %318 = vrot.lane.b32.xlu0 %v317_v48, %s3128_s23 }
 0x2f1   :  { %v319_v51 = vpop.permute.xlu0 %318 }
 0x2f2   :  { %2764 = vmatmul.mubr.msk.f32.vlgmr.msra.gmra.mxu0 %vm123_vm2, %v319_v51  ;;  %2769 = vmatmul.mubr.msk.f32.vlgmr.msra.gmra.mxu1 %vm123_vm2, %v319_v51 }
 0x2f3   :  { %2772 = vmatpush3.msra.mxu0 %v3241_v39  ;;  %2773 = vmatprep.mubr.msk.f32.mxu0 %vm3125_vm0, %v3124_v2 }
 0x2f4   :  { %2777 = vmatpush3.msra.mxu1 %v3246_v40  ;;  %2781 = vmatprep.subr.mxu0 %v3124_v2 }
 0x2f5   :  { %2778 = vmatprep.mubr.msk.f32.mxu1 %vm3125_vm0, %v3124_v2  ;;  %2786 = vmatprep.subr.mxu1 %v3124_v2 }
 0x3b2   :  { %v388_v53 = vpop.f32.mrf.mxu0  ;;  %v485_v54 = vpop.f32.mrf.mxu1 }
 0x3b3   :  { %v389_v55 = vadd.f32 %v388_v53, %v309_v49  ;;  %v490_v56 = vrot.slane %v485_v54, 7  ;;  %v494_v61 = vadd.f32 %v485_v54, %v3225_v16 }
 0x3b4   :  { %v2765_v57 = vpop.f32.mrf.mxu0  ;;  %v2770_v58 = vpop.f32.mrf.mxu1 }
 0x3b5   :  { %v398_v59 = vadd.f32 %v3274_v52, %v389_v55  ;;  %v493_v60 = vadd.f32 %v490_v56, %v3227_v18 }
 0x3b7   :  { %2898 = vtanh.f32 %v398_v59 }
 0x3b8   :  { %2900 = vtanh.f32 %v493_v60 }
 0x3b9   :  { %2902 = vtanh.f32 %v494_v61 }
 0x3c4   :  { %v2899_v62 = vpop.eup %2898 }
 0x3c5   :  { %v2901_v63 = vpop.eup %2900  ;;  %404 = vrot.lane.b32.xlu1 %v2899_v62, %s3126_s19  ;;  %v400_v1 = vmul.f32 0.5, %v2899_v62 }
 0x3c6   :  { %511 = vrot.lane.b32.xlu0 %v2901_v63, %s3126_s19  ;;  %v2903_v0 = vpop.eup %2902  ;;  %v497_v3 = vmul.f32 0.5, %v2901_v63 }
 0x3c7   :  { %v401_v4 = vadd.f32 0.5, %v400_v1  ;;  %v498_v5 = vmul.f32 0.5, %v2903_v0 }
 0x3c8   :  { %v499_v7 = vadd.f32 0.5, %v497_v3 }
 0x3c9   :  { %513 = vrot.lane.b32.xlu1 %v2903_v0, %s3126_s19  ;;  %v500_v12 = vadd.f32 0.5, %v498_v5  ;;  %v402_v17 = vmul.f32 0.0, %v401_v4 }
 0x3ca   :  { %v507_v19 = vmul.f32 %v503_v15, %v499_v7 }
 0x3cb   :  { %v508_v25 = vmul.f32 %v504_v21, %v500_v12 }
 0x437   :  { %v405_v8 = vpop.permute.xlu1 %404 }
 0x438   :  { %v512_v9 = vpop.permute.xlu0 %511  ;;  %v407_v10 = vmul.f32 %v405_v8, %v401_v4 }
 0x439   :  { %v517_v11 = vmul.f32 %v512_v9, %v499_v7 }
 0x43a   :  { %409 = vrot.lane.b32.xlu0 %v407_v10, %s3127_s20 }
 0x43b   :  { %521 = vrot.lane.b32.xlu1 %v517_v11, %s3127_s20  ;;  %v514_v13 = vpop.permute.xlu1 %513 }
 0x43c   :  { %v518_v14 = vmul.f32 %v514_v13, %v500_v12 }
 0x43e   :  { %523 = vrot.lane.b32.xlu0 %v518_v14, %s3127_s20 }
 0x4ac   :  { %v410_v20 = vpop.permute.xlu0 %409 }
 0x4ad   :  { %v522_v22 = vpop.permute.xlu1 %521  ;;  %v3287_v23 = vadd.f32 %v410_v20, %v402_v17 }
 0x4ae   :  { %v3289_v24 = vadd.f32 %v522_v22, %v507_v19 }
 0x4af   :  { %2904 = vtanh.f32 %v3287_v23 }
 0x4b0   :  { %2906 = vtanh.f32 %v3289_v24  ;;  %v524_v26 = vpop.permute.xlu0 %523  ;;  %v800_v9 = vrot.slane %v3289_v24, 7 }
 0x4b1   :  { %v3293_v27 = vadd.f32 %v524_v26, %v508_v25 }
 0x4b3   :  { %2908 = vtanh.f32 %v3293_v27  ;;  %v801_v13 = vrot.slane %v3293_v27, 7 }
 0x4bc   :  { %v2905_v28 = vpop.eup %2904 }
 0x4bd   :  { %v2907_v29 = vpop.eup %2906  ;;  %415 = vrot.lane.b32.xlu1 %v2905_v28, %s3127_s20 }
 0x4be   :  { %533 = vrot.lane.b32.xlu0 %v2907_v29, %s3127_s20 }
 0x4c0   :  { %v2909_v30 = vpop.eup %2908 }
 0x4c1   :  { %535 = vrot.lane.b32.xlu1 %v2909_v30, %s3127_s20 }
 0x52f   :  { %v416_v31 = vpop.permute.xlu1 %415 }
 0x530   :  { %v534_v32 = vpop.permute.xlu0 %533  ;;  %v418_v33 = vmul.f32 %v416_v31, %v401_v4 }
 0x531   :  { %v539_v34 = vmul.f32 %v534_v32, %v499_v7 }
 0x532   :  { %542 = vrot.lane.b32.xlu0 %v418_v33, %s3128_s23 }
 0x533   :  { %v536_v35 = vpop.permute.xlu1 %535  ;;  %v618_v36 = vrot.slane %v539_v34, 1 }
 0x534   :  { %v540_v37 = vmul.f32 %v536_v35, %v500_v12 }
 0x536   :  { %v619_v38 = vsel %vm316_vm1, %v540_v37, %v618_v36 }
 0x537   :  { %620 = vrot.lane.b32.xlu1 %v619_v38, %s3128_s23 }
 0x5a4   :  { %v543_v41 = vpop.permute.xlu0 %542 }
 0x5a5   :  { %2774 = vmatmul.mubr.msk.f32.vlgmr.msra.gmra.mxu0 %vm123_vm2, %v543_v41 }
 0x5a6   :  { %2782 = vmatpush3.msra.mxu0 %v3218_v6  ;;  %2783 = vmatprep.mubr.msk.f32.mxu0 %vm3125_vm0, %v3124_v2 }
 0x5a7   :  { %2791 = vmatprep.subr.mxu0 %v3124_v2 }
 0x5a9   :  { %v621_v42 = vpop.permute.xlu1 %620 }
 0x5aa   :  { %2779 = vmatmul.mubr.msk.f32.vlgmr.msra.gmra.mxu1 %vm123_vm2, %v621_v42  ;;  %2784 = vmatmul.mubr.msk.f32.vlgmr.msra.gmra.mxu0 %vm123_vm2, %v621_v42 }
 0x5ab   :  { %2787 = vmatpush3.msra.mxu1 %v3241_v39  ;;  %2788 = vmatprep.mubr.msk.f32.mxu1 %vm3125_vm0, %v3124_v2 }
 0x5ac   :  { %2792 = vmatpush3.msra.mxu0 %v3246_v40  ;;  %2796 = vmatprep.subr.mxu1 %v3124_v2 }
 0x5ad   :  { %2793 = vmatprep.mubr.msk.f32.mxu0 %vm3125_vm0, %v3124_v2  ;;  %2801 = vmatprep.subr.mxu0 %v3124_v2 }
 0x665   :  { %v612_v43 = vpop.f32.mrf.mxu0 }
 0x667   :  { %v2775_v44 = vpop.f32.mrf.mxu0 }
 0x66a   :  { %v690_v45 = vpop.f32.mrf.mxu1  ;;  %v781_v46 = vpop.f32.mrf.mxu0 }
 0x66b   :  { %v691_v47 = vadd.f32 %v690_v45, %v612_v43  ;;  %v786_v48 = vrot.slane %v781_v46, 6  ;;  %v787_v49 = vrot.slane %v781_v46, 7 }
 0x66c   :  { %v2780_v50 = vpop.f32.mrf.mxu1  ;;  %v2785_v51 = vpop.f32.mrf.mxu0 }
 0x66d   :  { %v694_v53 = vadd.f32 %v3274_v52, %v691_v47  ;;  %v790_v54 = vadd.f32 %v786_v48, %v3227_v18  ;;  %v791_v55 = vadd.f32 %v787_v49, %v3225_v16 }
 0x66f   :  { %2910 = vtanh.f32 %v694_v53 }
 0x670   :  { %2912 = vtanh.f32 %v790_v54 }
 0x671   :  { %2914 = vtanh.f32 %v791_v55 }
 0x67c   :  { %v2911_v56 = vpop.eup %2910 }
 0x67d   :  { %v2913_v57 = vpop.eup %2912  ;;  %700 = vrot.lane.b32.xlu0 %v2911_v56, %s3126_s19  ;;  %v696_v59 = vmul.f32 0.5, %v2911_v56 }
 0x67e   :  { %808 = vrot.lane.b32.xlu1 %v2913_v57, %s3126_s19  ;;  %v2915_v58 = vpop.eup %2914  ;;  %v794_v60 = vmul.f32 0.5, %v2913_v57 }
 0x67f   :  { %v697_v61 = vadd.f32 0.5, %v696_v59  ;;  %v795_v62 = vmul.f32 0.5, %v2915_v58 }
 0x680   :  { %v796_v0 = vadd.f32 0.5, %v794_v60 }
 0x681   :  { %810 = vrot.lane.b32.xlu0 %v2915_v58, %s3126_s19  ;;  %v797_v5 = vadd.f32 0.5, %v795_v62  ;;  %v698_v10 = vmul.f32 %v697_v61, %v3287_v23 }
 0x682   :  { %v804_v12 = vmul.f32 %v800_v9, %v796_v0 }
 0x683   :  { %v805_v19 = vmul.f32 %v801_v13, %v797_v5 }
 0x6ef   :  { %v701_v63 = vpop.permute.xlu0 %700 }
 0x6f0   :  { %v703_v1 = vmul.f32 %v701_v63, %v697_v61  ;;  %v809_v3 = vpop.permute.xlu1 %808 }
 0x6f1   :  { %v814_v4 = vmul.f32 %v809_v3, %v796_v0 }
 0x6f2   :  { %705 = vrot.lane.b32.xlu1 %v703_v1, %s3127_s20 }
 0x6f3   :  { %818 = vrot.lane.b32.xlu0 %v814_v4, %s3127_s20  ;;  %v811_v7 = vpop.permute.xlu0 %810 }
 0x6f4   :  { %v815_v8 = vmul.f32 %v811_v7, %v797_v5 }
 0x6f6   :  { %820 = vrot.lane.b32.xlu1 %v815_v8, %s3127_s20 }
 0x764   :  { %v706_v11 = vpop.permute.xlu1 %705 }
 0x765   :  { %v3329_v14 = vadd.f32 %v706_v11, %v698_v10  ;;  %v819_v15 = vpop.permute.xlu0 %818 }
 0x766   :  { %v3331_v17 = vadd.f32 %v819_v15, %v804_v12 }
 0x767   :  { %2916 = vtanh.f32 %v3329_v14 }
 0x768   :  { %2918 = vtanh.f32 %v3331_v17  ;;  %v821_v20 = vpop.permute.xlu1 %820  ;;  %v1098_v3 = vrot.slane %v3331_v17, 7 }
 0x769   :  { %v3335_v21 = vadd.f32 %v821_v20, %v805_v19 }
 0x76b   :  { %2920 = vtanh.f32 %v3335_v21  ;;  %v1099_v8 = vrot.slane %v3335_v21, 7 }
 0x774   :  { %v2917_v22 = vpop.eup %2916 }
 0x775   :  { %v2919_v23 = vpop.eup %2918  ;;  %711 = vrot.lane.b32.xlu0 %v2917_v22, %s3127_s20 }
 0x776   :  { %830 = vrot.lane.b32.xlu1 %v2919_v23, %s3127_s20 }
 0x778   :  { %v2921_v24 = vpop.eup %2920 }
 0x779   :  { %832 = vrot.lane.b32.xlu0 %v2921_v24, %s3127_s20 }
 0x7e7   :  { %v712_v25 = vpop.permute.xlu0 %711 }
 0x7e8   :  { %v714_v26 = vmul.f32 %v712_v25, %v697_v61  ;;  %v831_v27 = vpop.permute.xlu1 %830 }
 0x7e9   :  { %v836_v28 = vmul.f32 %v831_v27, %v796_v0 }
 0x7ea   :  { %839 = vrot.lane.b32.xlu1 %v714_v26, %s3128_s23 }
 0x7eb   :  { %v833_v29 = vpop.permute.xlu0 %832  ;;  %v915_v31 = vrot.slane %v836_v28, 2 }
 0x7ec   :  { %v837_v30 = vmul.f32 %v833_v29, %v797_v5 }
 0x7ee   :  { %v916_v32 = vrot.slane %v837_v30, 1 }
 0x7f0   :  { %v917_v33 = vsel %vm316_vm1, %v916_v32, %v915_v31 }
 0x7f1   :  { %918 = vrot.lane.b32.xlu0 %v917_v33, %s3128_s23 }
 0x85c   :  { %v840_v34 = vpop.permute.xlu1 %839 }
 0x85d   :  { %2789 = vmatmul.mubr.msk.f32.vlgmr.msra.gmra.mxu1 %vm123_vm2, %v840_v34 }
 0x85e   :  { %2797 = vmatpush3.msra.mxu1 %v3218_v6  ;;  %2798 = vmatprep.mubr.msk.f32.mxu1 %vm3125_vm0, %v3124_v2 }
 0x85f   :  { %2806 = vmatprep.subr.mxu1 %v3124_v2 }
 0x863   :  { %v919_v35 = vpop.permute.xlu0 %918 }
 0x864   :  { %2794 = vmatmul.mubr.msk.f32.vlgmr.msra.gmra.mxu0 %vm123_vm2, %v919_v35  ;;  %2799 = vmatmul.mubr.msk.f32.vlgmr.msra.gmra.mxu1 %vm123_vm2, %v919_v35 }
 0x865   :  { %2802 = vmatpush3.msra.mxu0 %v3241_v39  ;;  %2803 = vmatprep.mubr.msk.f32.mxu0 %vm3125_vm0, %v3124_v2 }
 0x866   :  { %2807 = vmatpush3.msra.mxu1 %v3246_v40  ;;  %2811 = vmatprep.subr.mxu0 %v3124_v2 }
 0x867   :  { %2808 = vmatprep.mubr.msk.f32.mxu1 %vm3125_vm0, %v3124_v2  ;;  %2816 = vmatprep.subr.mxu1 %v3124_v2 }
 0x91d   :  { %v909_v36 = vpop.f32.mrf.mxu1 }
 0x91f   :  { %v2790_v37 = vpop.f32.mrf.mxu1 }
 0x924   :  { %v988_v38 = vpop.f32.mrf.mxu0  ;;  %v1079_v41 = vpop.f32.mrf.mxu1 }
 0x925   :  { %v989_v42 = vadd.f32 %v988_v38, %v909_v36  ;;  %v1084_v43 = vrot.slane %v1079_v41, 5  ;;  %v1085_v44 = vrot.slane %v1079_v41, 6 }
 0x926   :  { %v2795_v45 = vpop.f32.mrf.mxu0  ;;  %v2800_v46 = vpop.f32.mrf.mxu1 }
 0x927   :  { %v992_v47 = vadd.f32 %v3274_v52, %v989_v42  ;;  %v1088_v48 = vadd.f32 %v1084_v43, %v3227_v18  ;;  %v1089_v49 = vadd.f32 %v1085_v44, %v3225_v16 }
 0x929   :  { %2922 = vtanh.f32 %v992_v47 }
 0x92a   :  { %2924 = vtanh.f32 %v1088_v48 }
 0x92b   :  { %2926 = vtanh.f32 %v1089_v49 }
 0x936   :  { %v2923_v50 = vpop.eup %2922 }
 0x937   :  { %v2925_v51 = vpop.eup %2924  ;;  %998 = vrot.lane.b32.xlu1 %v2923_v50, %s3126_s19  ;;  %v994_v54 = vmul.f32 0.5, %v2923_v50 }
 0x938   :  { %1106 = vrot.lane.b32.xlu0 %v2925_v51, %s3126_s19  ;;  %v2927_v53 = vpop.eup %2926  ;;  %v1092_v55 = vmul.f32 0.5, %v2925_v51 }
 0x939   :  { %v995_v56 = vadd.f32 0.5, %v994_v54  ;;  %v1093_v57 = vmul.f32 0.5, %v2927_v53 }
 0x93a   :  { %v1094_v58 = vadd.f32 0.5, %v1092_v55 }
 0x93b   :  { %1108 = vrot.lane.b32.xlu1 %v2927_v53, %s3126_s19  ;;  %v1095_v63 = vadd.f32 0.5, %v1093_v57  ;;  %v996_v4 = vmul.f32 %v995_v56, %v3329_v14 }
 0x93c   :  { %v1102_v5 = vmul.f32 %v1098_v3, %v1094_v58 }
 0x93d   :  { %v1103_v12 = vmul.f32 %v1099_v8, %v1095_v63 }
 0x9a9   :  { %v999_v59 = vpop.permute.xlu1 %998 }
 0x9aa   :  { %v1107_v60 = vpop.permute.xlu0 %1106  ;;  %v1001_v61 = vmul.f32 %v999_v59, %v995_v56 }
 0x9ab   :  { %v1112_v62 = vmul.f32 %v1107_v60, %v1094_v58 }
 0x9ac   :  { %1003 = vrot.lane.b32.xlu0 %v1001_v61, %s3127_s20 }
 0x9ad   :  { %1116 = vrot.lane.b32.xlu1 %v1112_v62, %s3127_s20  ;;  %v1109_v0 = vpop.permute.xlu1 %1108 }
 0x9ae   :  { %v1113_v1 = vmul.f32 %v1109_v0, %v1095_v63 }
 0x9b0   :  { %1118 = vrot.lane.b32.xlu0 %v1113_v1, %s3127_s20 }
 0xa1e   :  { %v1004_v7 = vpop.permute.xlu0 %1003 }
 0xa1f   :  { %v1117_v9 = vpop.permute.xlu1 %1116  ;;  %v3371_v10 = vadd.f32 %v1004_v7, %v996_v4 }
 0xa20   :  { %v3373_v11 = vadd.f32 %v1117_v9, %v1102_v5 }
 0xa21   :  { %2928 = vtanh.f32 %v3371_v10 }
 0xa22   :  { %2930 = vtanh.f32 %v3373_v11  ;;  %v1119_v13 = vpop.permute.xlu0 %1118  ;;  %v1396_v61 = vrot.slane %v3373_v11, 7 }
 0xa23   :  { %v3377_v15 = vadd.f32 %v1119_v13, %v1103_v12 }
 0xa25   :  { %2932 = vtanh.f32 %v3377_v15  ;;  %v1397_v1 = vrot.slane %v3377_v15, 7 }
 0xa2e   :  { %v2929_v14 = vpop.eup %2928 }
 0xa2f   :  { %v2931_v17 = vpop.eup %2930  ;;  %1009 = vrot.lane.b32.xlu1 %v2929_v14, %s3127_s20 }
 0xa30   :  { %1128 = vrot.lane.b32.xlu0 %v2931_v17, %s3127_s20 }
 0xa32   :  { %v2933_v19 = vpop.eup %2932 }
 0xa33   :  { %1130 = vrot.lane.b32.xlu1 %v2933_v19, %s3127_s20 }
 0xaa1   :  { %v1010_v20 = vpop.permute.xlu1 %1009 }
 0xaa2   :  { %v1129_v21 = vpop.permute.xlu0 %1128  ;;  %v1012_v22 = vmul.f32 %v1010_v20, %v995_v56 }
 0xaa3   :  { %v1134_v23 = vmul.f32 %v1129_v21, %v1094_v58 }
 0xaa4   :  { %1137 = vrot.lane.b32.xlu0 %v1012_v22, %s3128_s23 }
 0xaa5   :  { %v1131_v24 = vpop.permute.xlu1 %1130  ;;  %v1213_v26 = vrot.slane %v1134_v23, 3 }
 0xaa6   :  { %v1135_v25 = vmul.f32 %v1131_v24, %v1095_v63 }
 0xaa8   :  { %v1214_v27 = vrot.slane %v1135_v25, 2 }
 0xaaa   :  { %v1215_v28 = vsel %vm316_vm1, %v1214_v27, %v1213_v26 }
 0xaab   :  { %1216 = vrot.lane.b32.xlu1 %v1215_v28, %s3128_s23 }
 0xb16   :  { %v1138_v29 = vpop.permute.xlu0 %1137 }
 0xb17   :  { %2804 = vmatmul.mubr.msk.f32.vlgmr.msra.gmra.mxu0 %vm123_vm2, %v1138_v29 }
 0xb18   :  { %2812 = vmatpush3.msra.mxu0 %v3218_v6  ;;  %2813 = vmatprep.mubr.msk.f32.mxu0 %vm3125_vm0, %v3124_v2 }
 0xb19   :  { %2821 = vmatprep.subr.mxu0 %v3124_v2 }
 0xb1d   :  { %v1217_v30 = vpop.permute.xlu1 %1216 }
 0xb1e   :  { %2809 = vmatmul.mubr.msk.f32.vlgmr.msra.gmra.mxu1 %vm123_vm2, %v1217_v30  ;;  %2814 = vmatmul.mubr.msk.f32.vlgmr.msra.gmra.mxu0 %vm123_vm2, %v1217_v30 }
 0xb1f   :  { %2817 = vmatpush3.msra.mxu1 %v3241_v39  ;;  %2818 = vmatprep.mubr.msk.f32.mxu1 %vm3125_vm0, %v3124_v2 }
 0xb20   :  { %2822 = vmatpush3.msra.mxu0 %v3246_v40  ;;  %2826 = vmatprep.subr.mxu1 %v3124_v2 }
 0xb21   :  { %2823 = vmatprep.mubr.msk.f32.mxu0 %vm3125_vm0, %v3124_v2  ;;  %2831 = vmatprep.subr.mxu0 %v3124_v2 }
 0xbd7   :  { %v1207_v31 = vpop.f32.mrf.mxu0 }
 0xbd9   :  { %v2805_v32 = vpop.f32.mrf.mxu0 }
 0xbde   :  { %v1286_v33 = vpop.f32.mrf.mxu1  ;;  %v1377_v34 = vpop.f32.mrf.mxu0 }
 0xbdf   :  { %v1287_v35 = vadd.f32 %v1286_v33, %v1207_v31  ;;  %v1382_v36 = vrot.slane %v1377_v34, 4  ;;  %v1383_v37 = vrot.slane %v1377_v34, 5 }
 0xbe0   :  { %v2810_v38 = vpop.f32.mrf.mxu1  ;;  %v2815_v41 = vpop.f32.mrf.mxu0 }
 0xbe1   :  { %v1290_v42 = vadd.f32 %v3274_v52, %v1287_v35  ;;  %v1386_v43 = vadd.f32 %v1382_v36, %v3227_v18  ;;  %v1387_v44 = vadd.f32 %v1383_v37, %v3225_v16 }
 0xbe3   :  { %2934 = vtanh.f32 %v1290_v42 }
 0xbe4   :  { %2936 = vtanh.f32 %v1386_v43 }
 0xbe5   :  { %2938 = vtanh.f32 %v1387_v44 }
 0xbf0   :  { %v2935_v45 = vpop.eup %2934 }
 0xbf1   :  { %v2937_v46 = vpop.eup %2936  ;;  %1296 = vrot.lane.b32.xlu0 %v2935_v45, %s3126_s19  ;;  %v1292_v48 = vmul.f32 0.5, %v2935_v45 }
 0xbf2   :  { %1404 = vrot.lane.b32.xlu1 %v2937_v46, %s3126_s19  ;;  %v2939_v47 = vpop.eup %2938  ;;  %v1390_v49 = vmul.f32 0.5, %v2937_v46 }
 0xbf3   :  { %v1293_v50 = vadd.f32 0.5, %v1292_v48  ;;  %v1391_v51 = vmul.f32 0.5, %v2939_v47 }
 0xbf4   :  { %v1392_v54 = vadd.f32 0.5, %v1390_v49 }
 0xbf5   :  { %1406 = vrot.lane.b32.xlu0 %v2939_v47, %s3126_s19  ;;  %v1393_v58 = vadd.f32 0.5, %v1391_v51  ;;  %v1294_v62 = vmul.f32 %v1293_v50, %v3371_v10 }
 0xbf6   :  { %v1400_v0 = vmul.f32 %v1396_v61, %v1392_v54 }
 0xbf7   :  { %v1401_v7 = vmul.f32 %v1397_v1, %v1393_v58 }
 0xc63   :  { %v1297_v53 = vpop.permute.xlu0 %1296 }
 0xc64   :  { %v1299_v55 = vmul.f32 %v1297_v53, %v1293_v50  ;;  %v1405_v56 = vpop.permute.xlu1 %1404 }
 0xc65   :  { %v1410_v57 = vmul.f32 %v1405_v56, %v1392_v54 }
 0xc66   :  { %1301 = vrot.lane.b32.xlu1 %v1299_v55, %s3127_s20 }
 0xc67   :  { %1414 = vrot.lane.b32.xlu0 %v1410_v57, %s3127_s20  ;;  %v1407_v59 = vpop.permute.xlu0 %1406 }
 0xc68   :  { %v1411_v60 = vmul.f32 %v1407_v59, %v1393_v58 }
 0xc6a   :  { %1416 = vrot.lane.b32.xlu1 %v1411_v60, %s3127_s20 }
 0xcd8   :  { %v1302_v63 = vpop.permute.xlu1 %1301 }
 0xcd9   :  { %v3413_v3 = vadd.f32 %v1302_v63, %v1294_v62  ;;  %v1415_v4 = vpop.permute.xlu0 %1414 }
 0xcda   :  { %v3415_v5 = vadd.f32 %v1415_v4, %v1400_v0 }
 0xcdb   :  { %2940 = vtanh.f32 %v3413_v3 }
 0xcdc   :  { %2942 = vtanh.f32 %v3415_v5  ;;  %v1417_v8 = vpop.permute.xlu1 %1416  ;;  %v1694_v56 = vrot.slane %v3415_v5, 7 }
 0xcdd   :  { %v3419_v9 = vadd.f32 %v1417_v8, %v1401_v7 }
 0xcdf   :  { %2944 = vtanh.f32 %v3419_v9  ;;  %v1695_v60 = vrot.slane %v3419_v9, 7 }
 0xce8   :  { %v2941_v10 = vpop.eup %2940 }
 0xce9   :  { %v2943_v11 = vpop.eup %2942  ;;  %1307 = vrot.lane.b32.xlu0 %v2941_v10, %s3127_s20 }
 0xcea   :  { %1426 = vrot.lane.b32.xlu1 %v2943_v11, %s3127_s20 }
 0xcec   :  { %v2945_v12 = vpop.eup %2944 }
 0xced   :  { %1428 = vrot.lane.b32.xlu0 %v2945_v12, %s3127_s20 }
 0xd5b   :  { %v1308_v13 = vpop.permute.xlu0 %1307 }
 0xd5c   :  { %v1310_v15 = vmul.f32 %v1308_v13, %v1293_v50  ;;  %v1427_v14 = vpop.permute.xlu1 %1426 }
 0xd5d   :  { %v1432_v17 = vmul.f32 %v1427_v14, %v1392_v54 }
 0xd5e   :  { %1435 = vrot.lane.b32.xlu1 %v1310_v15, %s3128_s23 }
 0xd5f   :  { %v1429_v19 = vpop.permute.xlu0 %1428  ;;  %v1511_v21 = vrot.slane %v1432_v17, 4 }
 0xd60   :  { %v1433_v20 = vmul.f32 %v1429_v19, %v1393_v58 }
 0xd62   :  { %v1512_v22 = vrot.slane %v1433_v20, 3 }
 0xd64   :  { %v1513_v23 = vsel %vm316_vm1, %v1512_v22, %v1511_v21 }
 0xd65   :  { %1514 = vrot.lane.b32.xlu0 %v1513_v23, %s3128_s23 }
 0xdd0   :  { %v1436_v24 = vpop.permute.xlu1 %1435 }
 0xdd1   :  { %2819 = vmatmul.mubr.msk.f32.vlgmr.msra.gmra.mxu1 %vm123_vm2, %v1436_v24 }
 0xdd2   :  { %2827 = vmatpush3.msra.mxu1 %v3218_v6  ;;  %2828 = vmatprep.mubr.msk.f32.mxu1 %vm3125_vm0, %v3124_v2 }
 0xdd3   :  { %2836 = vmatprep.subr.mxu1 %v3124_v2 }
 0xdd7   :  { %v1515_v25 = vpop.permute.xlu0 %1514 }
 0xdd8   :  { %2824 = vmatmul.mubr.msk.f32.vlgmr.msra.gmra.mxu0 %vm123_vm2, %v1515_v25  ;;  %2829 = vmatmul.mubr.msk.f32.vlgmr.msra.gmra.mxu1 %vm123_vm2, %v1515_v25 }
 0xdd9   :  { %2832 = vmatpush3.msra.mxu0 %v3241_v39  ;;  %2833 = vmatprep.mubr.msk.f32.mxu0 %vm3125_vm0, %v3124_v2 }
 0xdda   :  { %2837 = vmatpush3.msra.mxu1 %v3246_v40  ;;  %2841 = vmatprep.subr.mxu0 %v3124_v2 }
 0xddb   :  { %2838 = vmatprep.mubr.msk.f32.mxu1 %vm3125_vm0, %v3124_v2  ;;  %2846 = vmatprep.subr.mxu1 %v3124_v2 }
 0xe91   :  { %v1505_v26 = vpop.f32.mrf.mxu1 }
 0xe93   :  { %v2820_v27 = vpop.f32.mrf.mxu1 }
 0xe98   :  { %v1584_v28 = vpop.f32.mrf.mxu0  ;;  %v1675_v29 = vpop.f32.mrf.mxu1 }
 0xe99   :  { %v1585_v30 = vadd.f32 %v1584_v28, %v1505_v26  ;;  %v1680_v31 = vrot.slane %v1675_v29, 3  ;;  %v1681_v32 = vrot.slane %v1675_v29, 4 }
 0xe9a   :  { %v2825_v33 = vpop.f32.mrf.mxu0  ;;  %v2830_v34 = vpop.f32.mrf.mxu1 }
 0xe9b   :  { %v1588_v35 = vadd.f32 %v3274_v52, %v1585_v30  ;;  %v1684_v36 = vadd.f32 %v1680_v31, %v3227_v18  ;;  %v1685_v37 = vadd.f32 %v1681_v32, %v3225_v16 }
 0xe9d   :  { %2946 = vtanh.f32 %v1588_v35 }
 0xe9e   :  { %2948 = vtanh.f32 %v1684_v36 }
 0xe9f   :  { %2950 = vtanh.f32 %v1685_v37 }
 0xeaa   :  { %v2947_v38 = vpop.eup %2946 }
 0xeab   :  { %v2949_v41 = vpop.eup %2948  ;;  %1594 = vrot.lane.b32.xlu1 %v2947_v38, %s3126_s19  ;;  %v1590_v43 = vmul.f32 0.5, %v2947_v38 }
 0xeac   :  { %1702 = vrot.lane.b32.xlu0 %v2949_v41, %s3126_s19  ;;  %v2951_v42 = vpop.eup %2950  ;;  %v1688_v44 = vmul.f32 0.5, %v2949_v41 }
 0xead   :  { %v1591_v45 = vadd.f32 0.5, %v1590_v43  ;;  %v1689_v46 = vmul.f32 0.5, %v2951_v42 }
 0xeae   :  { %v1690_v47 = vadd.f32 0.5, %v1688_v44 }
 0xeaf   :  { %1704 = vrot.lane.b32.xlu1 %v2951_v42, %s3126_s19  ;;  %v1691_v53 = vadd.f32 0.5, %v1689_v46  ;;  %v1592_v57 = vmul.f32 %v1591_v45, %v3413_v3 }
 0xeb0   :  { %v1698_v58 = vmul.f32 %v1694_v56, %v1690_v47 }
 0xeb1   :  { %v1699_v0 = vmul.f32 %v1695_v60, %v1691_v53 }
 0xf1d   :  { %v1595_v48 = vpop.permute.xlu1 %1594 }
 0xf1e   :  { %v1703_v49 = vpop.permute.xlu0 %1702  ;;  %v1597_v50 = vmul.f32 %v1595_v48, %v1591_v45 }
 0xf1f   :  { %v1708_v51 = vmul.f32 %v1703_v49, %v1690_v47 }
 0xf20   :  { %1599 = vrot.lane.b32.xlu0 %v1597_v50, %s3127_s20 }
 0xf21   :  { %1712 = vrot.lane.b32.xlu1 %v1708_v51, %s3127_s20  ;;  %v1705_v54 = vpop.permute.xlu1 %1704 }
 0xf22   :  { %v1709_v55 = vmul.f32 %v1705_v54, %v1691_v53 }
 0xf24   :  { %1714 = vrot.lane.b32.xlu0 %v1709_v55, %s3127_s20 }
 0xf92   :  { %v1600_v59 = vpop.permute.xlu0 %1599 }
 0xf93   :  { %v1713_v61 = vpop.permute.xlu1 %1712  ;;  %v3455_v62 = vadd.f32 %v1600_v59, %v1592_v57 }
 0xf94   :  { %v3457_v63 = vadd.f32 %v1713_v61, %v1698_v58 }
 0xf95   :  { %2952 = vtanh.f32 %v3455_v62 }
 0xf96   :  { %2954 = vtanh.f32 %v3457_v63  ;;  %v1715_v1 = vpop.permute.xlu0 %1714 }
 0xf97   :  { %v3461_v4 = vadd.f32 %v1715_v1, %v1699_v0 }
 0xf99   :  { %2956 = vtanh.f32 %v3461_v4  ;;  %v1993_v51 = vrot.slane %v3461_v4, 7 }
 0xfa2   :  { %v2953_v3 = vpop.eup %2952 }
 0xfa3   :  { %v2955_v5 = vpop.eup %2954  ;;  %1605 = vrot.lane.b32.xlu1 %v2953_v3, %s3127_s20 }
 0xfa4   :  { %1724 = vrot.lane.b32.xlu0 %v2955_v5, %s3127_s20 }
 0xfa6   :  { %v2957_v7 = vpop.eup %2956 }
 0xfa7   :  { %1726 = vrot.lane.b32.xlu1 %v2957_v7, %s3127_s20 }
0x1015   :  { %v1606_v8 = vpop.permute.xlu1 %1605 }
0x1016   :  { %v1725_v9 = vpop.permute.xlu0 %1724  ;;  %v1608_v10 = vmul.f32 %v1606_v8, %v1591_v45 }
0x1017   :  { %v1730_v11 = vmul.f32 %v1725_v9, %v1690_v47  ;;  %v1992_v47 = vrot.slane %v3457_v63, 7 }
0x1018   :  { %1733 = vrot.lane.b32.xlu0 %v1608_v10, %s3128_s23  ;;  %v2986_v10 = vld [vmem:[%s3585_s2] sm:$0xff] }
0x1019   :  { %v1727_v12 = vpop.permute.xlu1 %1726  ;;  %v1809_v15 = vrot.slane %v1730_v11, 5 }
0x101a   :  { %v1731_v13 = vmul.f32 %v1727_v12, %v1691_v53  ;;  %v2987_v12 = vld [vmem:[#allocation9] sm:$0xff] }
0x101c   :  { %v1810_v14 = vrot.slane %v1731_v13, 4  ;;  %v2988_v13 = vld [vmem:[%s3587_s4] sm:$0xff] }
0x101e   :  { %v1811_v17 = vsel %vm316_vm1, %v1810_v14, %v1809_v15 }
0x101f   :  { %1812 = vrot.lane.b32.xlu1 %v1811_v17, %s3128_s23 }
0x108a   :  { %v1734_v19 = vpop.permute.xlu0 %1733 }
0x108b   :  { %2834 = vmatmul.mubr.msk.f32.vlgmr.msra.gmra.mxu0 %vm123_vm2, %v1734_v19 }
0x108c   :  { %2842 = vmatpush3.msra.mxu0 %v3218_v6  ;;  %2843 = vmatprep.mubr.msk.f32.mxu0 %vm3125_vm0, %v3124_v2 }
0x108d   :  { %2851 = vmatprep.subr.mxu0 %v3124_v2 }
0x1091   :  { %v1813_v20 = vpop.permute.xlu1 %1812 }
0x1092   :  { %2839 = vmatmul.mubr.msk.f32.vlgmr.msra.gmra.mxu1 %vm123_vm2, %v1813_v20  ;;  %2844 = vmatmul.mubr.msk.f32.vlgmr.msra.gmra.mxu0 %vm123_vm2, %v1813_v20 }
0x1093   :  { %2847 = vmatpush3.msra.mxu1 %v3241_v39  ;;  %2848 = vmatprep.mubr.msk.f32.mxu1 %vm3125_vm0, %v3124_v2 }
0x1094   :  { %2856 = vmatprep.subr.mxu1 %v3124_v2  ;;  %2852 = vmatpush3.msra.mxu0 %v3246_v40 }
0x1095   :  { %2853 = vmatprep.mubr.msk.f32.mxu0 %vm3125_vm0, %v3124_v2  ;;  %2861 = vmatprep.subr.mxu0 %v3124_v2 }
0x114b   :  { %v1803_v6 = vpop.f32.mrf.mxu0 }
0x114d   :  { %v2835_v21 = vpop.f32.mrf.mxu0 }
0x1152   :  { %v1882_v22 = vpop.f32.mrf.mxu1  ;;  %v1973_v23 = vpop.f32.mrf.mxu0 }
0x1153   :  { %v1883_v24 = vadd.f32 %v1882_v22, %v1803_v6  ;;  %v1978_v25 = vrot.slane %v1973_v23, 2  ;;  %v1979_v26 = vrot.slane %v1973_v23, 3 }
0x1154   :  { %v2840_v39 = vpop.f32.mrf.mxu1  ;;  %v2845_v27 = vpop.f32.mrf.mxu0 }
0x1155   :  { %v1886_v28 = vadd.f32 %v3274_v52, %v1883_v24  ;;  %v1982_v29 = vadd.f32 %v1978_v25, %v3227_v18  ;;  %v1983_v40 = vadd.f32 %v1979_v26, %v3225_v16 }
0x1157   :  { %2958 = vtanh.f32 %v1886_v28 }
0x1158   :  { %2960 = vtanh.f32 %v1982_v29 }
0x1159   :  { %2962 = vtanh.f32 %v1983_v40 }
0x1164   :  { %v2959_v30 = vpop.eup %2958 }
0x1165   :  { %v2961_v31 = vpop.eup %2960  ;;  %1892 = vrot.lane.b32.xlu0 %v2959_v30, %s3126_s19  ;;  %v1888_v33 = vmul.f32 0.5, %v2959_v30 }
0x1166   :  { %2000 = vrot.lane.b32.xlu1 %v2961_v31, %s3126_s19  ;;  %v2963_v32 = vpop.eup %2962  ;;  %v1986_v34 = vmul.f32 0.5, %v2961_v31 }
0x1167   :  { %v1889_v35 = vadd.f32 0.5, %v1888_v33  ;;  %v1987_v36 = vmul.f32 0.5, %v2963_v32 }
0x1168   :  { %v1988_v38 = vadd.f32 0.5, %v1986_v34 }
0x1169   :  { %2002 = vrot.lane.b32.xlu0 %v2963_v32, %s3126_s19  ;;  %v1989_v44 = vadd.f32 0.5, %v1987_v36  ;;  %v1890_v48 = vmul.f32 %v1889_v35, %v3455_v62 }
0x116a   :  { %v1996_v50 = vmul.f32 %v1992_v47, %v1988_v38 }
0x116b   :  { %v1997_v56 = vmul.f32 %v1993_v51, %v1989_v44 }
0x11d7   :  { %v1893_v37 = vpop.permute.xlu0 %1892 }
0x11d8   :  { %v1895_v41 = vmul.f32 %v1893_v37, %v1889_v35  ;;  %v2001_v42 = vpop.permute.xlu1 %2000 }
0x11d9   :  { %v2006_v43 = vmul.f32 %v2001_v42, %v1988_v38 }
0x11da   :  { %1897 = vrot.lane.b32.xlu1 %v1895_v41, %s3127_s20 }
0x11db   :  { %2010 = vrot.lane.b32.xlu0 %v2006_v43, %s3127_s20  ;;  %v2003_v45 = vpop.permute.xlu0 %2002 }
0x11dc   :  { %v2007_v46 = vmul.f32 %v2003_v45, %v1989_v44 }
0x11de   :  { %2012 = vrot.lane.b32.xlu1 %v2007_v46, %s3127_s20 }
0x124c   :  { %v1898_v49 = vpop.permute.xlu1 %1897 }
0x124d   :  { %v3497_v53 = vadd.f32 %v1898_v49, %v1890_v48  ;;  %v2011_v54 = vpop.permute.xlu0 %2010 }
0x124e   :  { %v3499_v55 = vadd.f32 %v2011_v54, %v1996_v50 }
0x124f   :  { %2964 = vtanh.f32 %v3497_v53 }
0x1250   :  { %2966 = vtanh.f32 %v3499_v55  ;;  %v2013_v57 = vpop.permute.xlu1 %2012  ;;  %v2290_v37 = vrot.slane %v3499_v55, 7 }
0x1251   :  { %v3503_v58 = vadd.f32 %v2013_v57, %v1997_v56 }
0x1253   :  { %2968 = vtanh.f32 %v3503_v58 }
0x125c   :  { %v2965_v59 = vpop.eup %2964 }
0x125d   :  { %v2967_v60 = vpop.eup %2966  ;;  %1903 = vrot.lane.b32.xlu0 %v2965_v59, %s3127_s20 }
0x125e   :  { %2022 = vrot.lane.b32.xlu1 %v2967_v60, %s3127_s20 }
0x1260   :  { %v2969_v61 = vpop.eup %2968 }
0x1261   :  { %2024 = vrot.lane.b32.xlu0 %v2969_v61, %s3127_s20 }
0x12cf   :  { %v1904_v62 = vpop.permute.xlu0 %1903 }
0x12d0   :  { %v1906_v63 = vmul.f32 %v1904_v62, %v1889_v35  ;;  %v2023_v0 = vpop.permute.xlu1 %2022 }
0x12d1   :  { %v2028_v1 = vmul.f32 %v2023_v0, %v1988_v38  ;;  %v2291_v38 = vrot.slane %v3503_v58, 7 }
0x12d2   :  { %2031 = vrot.lane.b32.xlu1 %v1906_v63, %s3128_s23 }
0x12d3   :  { %v2025_v4 = vpop.permute.xlu0 %2024  ;;  %v2107_v5 = vrot.slane %v2028_v1, 6 }
0x12d4   :  { %v2029_v3 = vmul.f32 %v2025_v4, %v1989_v44 }
0x12d6   :  { %v2108_v7 = vrot.slane %v2029_v3, 5 }
0x12d8   :  { %v2109_v8 = vsel %vm316_vm1, %v2108_v7, %v2107_v5 }
0x12d9   :  { %2110 = vrot.lane.b32.xlu0 %v2109_v8, %s3128_s23  ;;  %v2989_v8 = vld [vmem:[%s3589_s6] ss:$0 sm:$0xff] }
0x1344   :  { %v2032_v9 = vpop.permute.xlu1 %2031 }
0x1345   :  { %2849 = vmatmul.mubr.msk.f32.vlgmr.msra.gmra.mxu1 %vm123_vm2, %v2032_v9 }
0x1346   :  { %2857 = vmatpush3.msra.mxu1 %v2986_v10  ;;  %2858 = vmatprep.mubr.msk.f32.mxu1 %vm3125_vm0, %v3124_v2 }
0x1347   :  { %2866 = vmatprep.subr.mxu1 %v3124_v2 }
0x134b   :  { %v2111_v11 = vpop.permute.xlu0 %2110 }
0x134c   :  { %2854 = vmatmul.mubr.msk.f32.vlgmr.msra.gmra.mxu0 %vm123_vm2, %v2111_v11  ;;  %2859 = vmatmul.mubr.msk.f32.vlgmr.msra.gmra.mxu1 %vm123_vm2, %v2111_v11 }
0x134d   :  { %2862 = vmatpush3.msra.mxu0 %v2987_v12  ;;  %2867 = vmatpush3.msra.mxu1 %v2988_v13 }
0x134e   :  { %2868 = vmatprep.mubr.msk.f32.mxu1 %vm3125_vm0, %v3124_v2  ;;  %2863 = vmatprep.mubr.msk.f32.mxu0 %vm3125_vm0, %v3124_v2 }
0x134f   :  { %2871 = vmatprep.subr.mxu0 %v3124_v2 }
0x1405   :  { %v2101_v15 = vpop.f32.mrf.mxu1 }
0x1407   :  { %v2850_v14 = vpop.f32.mrf.mxu1 }
0x140c   :  { %v2180_v17 = vpop.f32.mrf.mxu0  ;;  %v2271_v19 = vpop.f32.mrf.mxu1 }
0x140d   :  { %v2276_v20 = vrot.slane %v2271_v19, 1  ;;  %v2277_v6 = vrot.slane %v2271_v19, 2  ;;  %v2181_v21 = vadd.f32 %v2180_v17, %v2101_v15 }
0x140e   :  { %v2855_v22 = vpop.f32.mrf.mxu0  ;;  %v2860_v23 = vpop.f32.mrf.mxu1 }
0x140f   :  { %v2280_v24 = vadd.f32 %v2276_v20, %v3227_v18  ;;  %v2281_v25 = vadd.f32 %v2277_v6, %v3225_v16  ;;  %v2184_v26 = vadd.f32 %v3274_v52, %v2181_v21  ;;  %v2503_v20 = vld [vmem:[%s3590_s7] sm:$0xff]  ;;  %s3130_s7 = smov [#allocation11]  }
0x1410   :  { %s2640_s12 = sshll.u32 %s3130_s7, 4  ;;  %s2641_s12 = int_to_ptr.vmem [resolvable:$true] %s2640_s12 }
0x1411   :  { %2970 = vtanh.f32 %v2280_v24  ;;  %s3070_s1 = scalar_lea.vmem %s2641_s12, 64  ;;  %p3075_p7 = scmp.lt.s32.totalorder %s2641_s12, %s2641_s12 }
0x1412   :  { %2972 = vtanh.f32 %v2281_v25  ;;  %p3071_p6 = scmp.ne.s32.totalorder %s2641_s12, %s3070_s1  ;;  %p3076_p8 = scmp.lt.s32.totalorder %s3070_s1, %s3070_s1 }
0x1413   :  { %2974 = vtanh.f32 %v2184_v26 }
0x1414   :  { %p3077_p9 = por %p3076_p8, %p3075_p7 }
0x1416   :  { %p3078_p10 = pnand %p3077_p9, %p3071_p6 }
0x141e   :  { %v2971_v39 = vpop.eup %2970 }
0x141f   :  { %v2973_v27 = vpop.eup %2972  ;;  %2298 = vrot.lane.b32.xlu1 %v2971_v39, %s3126_s19  ;;  %v2284_v29 = vmul.f32 0.5, %v2971_v39 }
0x1420   :  { %2300 = vrot.lane.b32.xlu0 %v2973_v27, %s3126_s19  ;;  %v2975_v28 = vpop.eup %2974  ;;  %v2285_v40 = vmul.f32 0.5, %v2973_v27 }
0x1421   :  { %v2286_v30 = vadd.f32 0.5, %v2284_v29  ;;  %v2186_v18 = vmul.f32 0.5, %v2975_v28 }
0x1422   :  { %v2287_v31 = vadd.f32 0.5, %v2285_v40 }
0x1423   :  { %2190 = vrot.lane.b32.xlu1 %v2975_v28, %s3126_s19  ;;  %v2187_v34 = vadd.f32 0.5, %v2186_v18  ;;  %v2294_v41 = vmul.f32 %v2290_v37, %v2286_v30 }
0x1424   :  { %v2295_v43 = vmul.f32 %v2291_v38, %v2287_v31 }
0x1425   :  { %v2188_v47 = vmul.f32 %v2187_v34, %v3497_v53 }
0x1491   :  { %v2299_v16 = vpop.permute.xlu1 %2298 }
0x1492   :  { %v2301_v32 = vpop.permute.xlu0 %2300  ;;  %v2304_v52 = vmul.f32 %v2299_v16, %v2286_v30 }
0x1493   :  { %v2305_v33 = vmul.f32 %v2301_v32, %v2287_v31 }
0x1494   :  { %2308 = vrot.lane.b32.xlu0 %v2304_v52, %s3127_s20 }
0x1495   :  { %2310 = vrot.lane.b32.xlu1 %v2305_v33, %s3127_s20  ;;  %v2191_v35 = vpop.permute.xlu1 %2190 }
0x1496   :  { %v2193_v36 = vmul.f32 %v2191_v35, %v2187_v34 }
0x1498   :  { %2195 = vrot.lane.b32.xlu0 %v2193_v36, %s3127_s20 }
0x1506   :  { %v2309_v42 = vpop.permute.xlu0 %2308 }
0x1507   :  { %v2314_v44 = vadd.f32 %v2309_v42, %v2294_v41  ;;  %v2311_v45 = vpop.permute.xlu1 %2310 }
0x1508   :  { %v3540_v46 = vadd.f32 %v2311_v45, %v2295_v43 }
0x1509   :  { %2976 = vtanh.f32 %v2314_v44 }
0x150a   :  { %2978 = vtanh.f32 %v3540_v46  ;;  %v2196_v48 = vpop.permute.xlu0 %2195  ;;  %v2615_v39 = vrot.slane %v3540_v46, 7 }
0x150b   :  { %v2198_v49 = vadd.f32 %v2196_v48, %v2188_v47 }
0x150d   :  { %2980 = vtanh.f32 %v2198_v49 }
0x1516   :  { %v2977_v50 = vpop.eup %2976 }
0x1517   :  { %v2979_v51 = vpop.eup %2978  ;;  %2320 = vrot.lane.b32.xlu1 %v2977_v50, %s3127_s20 }
0x1518   :  { %2322 = vrot.lane.b32.xlu0 %v2979_v51, %s3127_s20 }
0x151a   :  { %v2981_v54 = vpop.eup %2980 }
0x151b   :  { %2201 = vrot.lane.b32.xlu1 %v2981_v54, %s3127_s20 }
0x1589   :  { %v2321_v55 = vpop.permute.xlu1 %2320 }
0x158a   :  { %v2326_v56 = vmul.f32 %v2321_v55, %v2286_v30  ;;  %v2323_v57 = vpop.permute.xlu0 %2322 }
0x158b   :  { %v2327_v58 = vmul.f32 %v2323_v57, %v2287_v31 }
0x158c   :  { %v2405_v59 = vrot.slane %v2326_v56, 7 }
0x158d   :  { %v2406_v53 = vrot.slane %v2327_v58, 6  ;;  %v2202_v60 = vpop.permute.xlu1 %2201  ;;  %v2590_v24 = vrot.slane %v2327_v58, 7 }
0x158e   :  { %v2204_v61 = vmul.f32 %v2202_v60, %v2187_v34 }
0x158f   :  { %v2407_v62 = vsel %vm316_vm1, %v2406_v53, %v2405_v59 }
0x1590   :  { %2408 = vrot.lane.b32.xlu1 %v2407_v62, %s3128_s23  ;;  %2329 = vrot.lane.b32.xlu0 %v2204_v61, %s3128_s23 }
0x1602   :  { %v2409_v63 = vpop.permute.xlu1 %2408  ;;  %v2330_v0 = vpop.permute.xlu0 %2329 }
0x1603   :  { %2869 = vmatmul.mubr.msk.f32.vlgmr.msra.gmra.mxu1 %vm123_vm2, %v2409_v63  ;;  %2864 = vmatmul.mubr.msk.f32.vlgmr.msra.gmra.mxu0 %vm123_vm2, %v2330_v0 }
0x1604   :  { %2873 = vmatprep.mubr.msk.f32.mxu0 %vm3125_vm0, %v3124_v2  ;;  %2872 = vmatpush3.msra.mxu0 %v2503_v20 }
0x16c3   :  { %v2478_v1 = vpop.f32.mrf.mxu1  ;;  %v2399_v4 = vpop.f32.mrf.mxu0 }
0x16c4   :  { %v2479_v3 = vadd.f32 %v2478_v1, %v2399_v4 }
0x16c5   :  { %v2870_v5 = vpop.f32.mrf.mxu1  ;;  %v2865_v7 = vpop.f32.mrf.mxu0 }
0x16c6   :  { %v2482_v9 = vadd.f32 %v2989_v8, %v2479_v3 }
0x16c8   :  { %2982 = vtanh.f32 %v2482_v9 }
0x16d5   :  { %v2983_v10 = vpop.eup %2982 }
0x16d6   :  { %2488 = vrot.lane.b32.xlu0 %v2983_v10, %s3126_s19  ;;  %v2484_v11 = vmul.f32 0.5, %v2983_v10 }
0x16d8   :  { %v2485_v12 = vadd.f32 0.5, %v2484_v11 }
0x16da   :  { %v2486_v2 = vmul.f32 %v2485_v12, %v2198_v49 }
0x1748   :  { %v2489_v13 = vpop.permute.xlu0 %2488 }
0x1749   :  { %v2491_v15 = vmul.f32 %v2489_v13, %v2485_v12 }
0x174b   :  { %2493 = vrot.lane.b32.xlu1 %v2491_v15, %s3127_s20 }
0x17bd   :  { %v2494_v14 = vpop.permute.xlu1 %2493 }
0x17be   :  { %v2496_v17 = vadd.f32 %v2494_v14, %v2486_v2 }
0x17c0   :  { %2984 = vtanh.f32 %v2496_v17  ;;  %v2611_v25 = vrot.slane %v2496_v17, 1  ;;  %v2700_v28 = vrot.slane %v2496_v17, 9 }
0x17cd   :  { %v2985_v19 = vpop.eup %2984 }
0x17ce   :  { %2499 = vrot.lane.b32.xlu0 %v2985_v19, %s3127_s20 }
0x17d2   :  { %2592 = vrot.lane.b32.xlu0 %v2326_v56, %s3128_s23 }
0x17d6   :  { %2617 = vrot.lane.b32.xlu0 %v2314_v44, %s3129_s30 }
0x1840   :  { %v2500_v6 = vpop.permute.xlu0 %2499 }
0x1841   :  { %v2502_v21 = vmul.f32 %v2500_v6, %v2485_v12 }
0x1843   :  { %2512 = vrot.lane.b32.xlu1 %v2502_v21, %s3128_s23  ;;  %v2588_v22 = vrot.slane %v2502_v21, 1  ;;  %v2699_v27 = vrot.slane %v2502_v21, 9 }
0x1844   :  { %v2593_v23 = vpop.permute.xlu0 %2592 }
0x1845   :  { %2605 = vst.msk [vmem:[#allocation11 - $0x7] sm:$0x80] %vm2604_vm3, %v2593_v23  ;;  %2596 = vrot.lane.b32.xlu0 %v2588_v22, %s3128_s23 }
0x1847   :  { %2594 = vrot.lane.b32.xlu1 %v2590_v24, %s3128_s23 }
0x1848   :  { %v2618_v26 = vpop.permute.xlu0 %2617 }
0x1849   :  { %2629 = vst.msk [vmem:[#allocation12 - $0x7] sm:$0x80] %vm2604_vm3, %v2618_v26  ;;  %2621 = vrot.lane.b32.xlu0 %v2611_v25, %s3129_s30 }
0x184b   :  { %2619 = vrot.lane.b32.xlu1 %v2615_v39, %s3129_s30 }
0x184f   :  { %2598 = vrot.lane.b32.xlu1 %v2699_v27, %s3128_s23 }
0x1853   :  { %2623 = vrot.lane.b32.xlu1 %v2700_v28, %s3129_s30 }
0x18b5   :  { %v2513_v29 = vpop.permute.xlu1 %2512 }
0x18b6   :  { %2874 = vmatmul.mubr.msk.f32.vlgmr.msra.gmra.mxu0 %vm123_vm2, %v2513_v29 }
0x18b7   :  { %v2597_v40 = vpop.permute.xlu0 %2596 }
0x18b8   :  { %2608 = vst.msk [vmem:[#allocation11 - $0x5] sm:$0x80] %vm2604_vm3, %v2597_v40 }
0x18b9   :  { %v2595_v30 = vpop.permute.xlu1 %2594 }
0x18ba   :  { %2607 = vst.msk [vmem:[#allocation11 + $0x1] sm:$0x1] %vm2606_vm4, %v2595_v30 }
0x18bb   :  { %v2622_v18 = vpop.permute.xlu0 %2621 }
0x18bc   :  { %2631 = vst.msk [vmem:[#allocation12 - $0x5] sm:$0x80] %vm2604_vm3, %v2622_v18 }
0x18bd   :  { %v2620_v31 = vpop.permute.xlu1 %2619 }
0x18be   :  { %2630 = vst.msk [vmem:[#allocation12 + $0x1] sm:$0x1] %vm2606_vm4, %v2620_v31 }
0x18c1   :  { %v2599_v16 = vpop.permute.xlu1 %2598 }
0x18c2   :  { %2609 = vst.msk [vmem:[#allocation11 + $0x3] sm:$0x1] %vm2606_vm4, %v2599_v16 }
0x18c5   :  { %v2624_v32 = vpop.permute.xlu1 %2623 }
0x18c6   :  { %2632 = vst.msk [vmem:[#allocation12 + $0x3] sm:$0x1] %vm2606_vm4, %v2624_v32 }
0x18c7   :  { %3081 = shalt.err (!%p3078_p10)
}
0x18c8   :  { %s3132_s15 = smov 32   ;;  %s3133_s16 = smov 2  }
0x18c9   :  { %2646 = dma.vmem_to_hbm [thread:$0]  %s2641_s12, 64, %s3593_s10, [#allocation5], %s3132_s15, %s3132_s15, %s3133_s16  }
0x18ca   :  { %s3090_s18 = scalar_lea.vmem %s2653_s14, 64  ;;  %p3095_p12 = scmp.lt.s32.totalorder %s2653_s14, %s2653_s14 }
0x18cb   :  { %p3091_p11 = scmp.ne.s32.totalorder %s2653_s14, %s3090_s18  ;;  %p3096_p13 = scmp.lt.s32.totalorder %s3090_s18, %s3090_s18 }
0x18cd   :  { %p3097_p0 = por %p3096_p13, %p3095_p12 }
0x18cf   :  { %p3098_p1 = pnand %p3097_p0, %p3091_p11 }
0x18d1   :  { %3101 = shalt.err (!%p3098_p1)
}
0x18d2   :  { %2658 = dma.vmem_to_hbm [thread:$0]  %s2653_s14, 64, %s3594_s11, [#allocation13], %s3132_s15, %s3132_s15, %s3133_s16   ;;  %v2697_v52 = vld [vmem:[#allocation2] ss:$0 sm:$0xff]  ;;  %vm2586_vm5 = vcmask 1024  }
0x1976   :  { %v2582_v33 = vpop.f32.mrf.mxu0 }
0x1977   :  { %v2583_v34 = vadd.f32 %v2697_v52, %v2582_v33 }
0x1978   :  { %v2875_v35 = vpop.f32.mrf.mxu0 }
0x1979   :  { %2587 = vst.msk [vmem:[%s3592_s9] sm:$0x3] %vm2586_vm5, %v2583_v34 }
0x197a   :  { %3116 = dma.done.wait [#allocation5], 64  }
0x197b   :  { %3117 = vsyncadd [#allocation5], 4294967232 }
0x197c   :  { %3118 = dma.done.wait [#allocation13], 64  }
0x197d   :  { %3119 = vsyncadd [#allocation13], 4294967232 }
0x197e   :  { %2667 = vsyncpa [#allocation4], 1 }
0x197f   :  { %2668 = vsyncpa [#allocation7], 1 }
0x1980   :  { %2669 = vsyncpa [#allocation10], 1 }
0x1981   :  { %2670 = vsyncpa [#allocation5], 1 }
0x1982   :  { %2671 = vsyncpa [#allocation13], 1 }

</bundles_post_ra>
